<compile_context>
chip_gen: v6e
topology: v6e:2x2x1
jax: 0.10.0
libtpu: 0.0.40
codegen_flags: <defaults>
</compile_context>

<pallas_src>
import functools

import jax
import jax.numpy as jnp
from jax.experimental import pallas as pl
from jax.experimental.pallas import tpu as pltpu

_F = 128  # padded feature width (lane-dense)


def _policy_mlp_kernel(x_ref, w_ref, b_ref, o_ref, *, num_layers, in_dim):
    """Fused MLP forward + softmax for one batch tile.

    x_ref : [TB, in_dim]   f32  (raw, unpadded input features)
    w_ref : [L, 128, 128]  f32  (zero-padded, pre-transposed weights; VMEM-resident)
    b_ref : [L, 1, 128]    f32  (zero-padded biases; last layer pad cols = -1e30)
    o_ref : [TB, 128]      f32  (softmax probs; pad cols are exactly 0)
    """
    # First layer at K=in_dim: MXU pads the contraction internally; weight rows
    # beyond in_dim are zero anyway, so slicing them off is exact.
    h = jnp.dot(x_ref[...], w_ref[0, :in_dim, :],
                preferred_element_type=jnp.float32) + b_ref[0]
    for i in range(1, num_layers):
        h = jnp.maximum(h, 0.0)
        h = jnp.dot(h, w_ref[i], preferred_element_type=jnp.float32) + b_ref[i]

    # Numerically stable softmax over the (padded) feature axis.  Pad columns carry
    # a -1e30 bias (valid while the bias slab stays f32), so exp() underflows to
    # exactly 0 and the denominator is exact.  Exact divide (not approx reciprocal)
    # so probabilities are normalized to f32 rounding.
    m = jnp.max(h, axis=-1, keepdims=True)
    e = jnp.exp(h - m)
    o_ref[...] = e / jnp.sum(e, axis=-1, keepdims=True)


def pack_params(params, out_dim):
    """Pack per-layer (W[in,out], b[out]) into padded f32 slabs (do ONCE per weight set).

    Returns:
      w_packed: [L, 128, 128] f32, zero-padded
      b_packed: [L, 1, 128]   f32, zero-padded; final layer's pad columns set to
                -1e30 so padded logits never contribute to the softmax.
    """
    L = len(params)
    w_packed = jnp.zeros((L, _F, _F), jnp.float32)
    b_packed = jnp.zeros((L, 1, _F), jnp.float32)
    for i, (W, b) in enumerate(params):
        fi, fo = W.shape
        assert fi <= _F and fo <= _F, "feature dims must fit in one 128-lane tile"
        w_packed = w_packed.at[i, :fi, :fo].set(W)
        b_packed = b_packed.at[i, 0, :fo].set(b)
    # NOTE: -1e30 is only exact-as-intended in f32; it would become -inf in bf16
    # (still functionally fine, but keep this in mind if the slab dtype changes).
    b_packed = b_packed.at[L - 1, 0, out_dim:].set(-1e30)
    return w_packed, b_packed


def default_num_tiles():
    """One grid step per TensorCore: 2 on v7x (dual-TC), 1 on v5e/v6e (single-TC)."""
    try:
        kind = jax.devices()[0].device_kind.lower()
    except Exception:
        return 1
    return 2 if "7" in kind else 1


@functools.partial(jax.jit, static_argnames=("out_dim", "num_tiles"))
def policy_forward(x, w_packed, b_packed, *, out_dim, num_tiles=1):
    """x: [B, input_dim] f32; returns softmax probs [B, out_dim] f32."""
    L = w_packed.shape[0]
    B, in_dim = x.shape

    # Pad the batch only enough to split it into `num_tiles` sublane-aligned tiles.
    mult = 8 * num_tiles
    B_pad = ((B + mult - 1) // mult) * mult
    if B_pad != B:
        x = jnp.pad(x, ((0, B_pad - B), (0, 0)))
    block_b = B_pad // num_tiles

    flops = 2 * B_pad * _F * _F * L
    bytes_accessed = (B_pad * in_dim * 4 + w_packed.size * 4
                      + b_packed.size * 4 + B_pad * _F * 4)

    out = pl.pallas_call(
        functools.partial(_policy_mlp_kernel, num_layers=L, in_dim=in_dim),
        out_shape=jax.ShapeDtypeStruct((B_pad, _F), jnp.float32),
        grid=(num_tiles,),
        in_specs=[
            pl.BlockSpec((block_b, in_dim), lambda i: (i, 0)),  # batch-tiled activations
            pl.BlockSpec((L, _F, _F), lambda i: (0, 0, 0)),     # weights: VMEM-resident
            pl.BlockSpec((L, 1, _F), lambda i: (0, 0, 0)),      # biases:  VMEM-resident
        ],
        out_specs=pl.BlockSpec((block_b, _F), lambda i: (i, 0)),
        compiler_params=pltpu.CompilerParams(
            dimension_semantics=("parallel",)),                  # megacore sharding on v7x
        cost_estimate=pl.CostEstimate(
            flops=flops,
            transcendentals=B_pad * _F,
            bytes_accessed=bytes_accessed),
    )(x, w_packed, b_packed)

    return out[:B, :out_dim]


def init_params(key, input_dim, hidden_layers, output_dim):
    """Deterministic init mimicking nn.Linear's U(-1/sqrt(in), 1/sqrt(in)).

    Weights stored as [in_features, out_features] (pre-transposed for y = x @ W + b).
    """
    dims = [input_dim] + list(hidden_layers) + [output_dim]
    params = []
    for i in range(len(dims) - 1):
        fan_in, fan_out = dims[i], dims[i + 1]
        key, kw, kb = jax.random.split(key, 3)
        bound = 1.0 / (fan_in ** 0.5)
        W = jax.random.uniform(kw, (fan_in, fan_out), jnp.float32, -bound, bound)
        b = jax.random.uniform(kb, (fan_out,), jnp.float32, -bound, bound)
        params.append((W, b))
    return params


if __name__ == "__main__":
    # module config: input_dim=(4,), layers=[32, 32], output_dim=6
    input_dim = 4
    hidden_layers = [32, 32]
    output_dim = 6
    batch = 512  # batched rollout of states per call (amortizes launch + DMA overhead)

    key = jax.random.PRNGKey(0)
    key, kx = jax.random.split(key)
    x = jax.random.normal(kx, (batch, input_dim), jnp.float32)

    params = init_params(key, input_dim, hidden_layers, output_dim)
    w_packed, b_packed = pack_params(params, output_dim)   # pack once, reuse every step

    num_tiles = default_num_tiles()                         # 1 (v5e/v6e) or 2 (v7x)
    probs = policy_forward(x, w_packed, b_packed,
                           out_dim=output_dim, num_tiles=num_tiles)
    probs = jax.block_until_ready(probs)

    # pure-JAX f32 reference (matches the PyTorch module's f32 Linear layers)
    def ref(xx, ps):
        h = xx
        for i, (W, b) in enumerate(ps):
            if i > 0:
                h = jnp.maximum(h, 0.0)
            h = jnp.dot(h, W, precision="highest") + b
        return jax.nn.softmax(h, axis=-1)

    expected = ref(x, params)
    assert probs.shape == (batch, output_dim)
    assert bool(jnp.all(jnp.isfinite(probs)))
    assert jnp.allclose(jnp.sum(probs, axis=-1), 1.0, atol=1e-4)
    assert jnp.allclose(probs, expected, atol=1e-3, rtol=1e-3)

    print("KERNEL_OK")
</pallas_src>

<mosaic_0001>
module attributes {stable_mosaic.version = 11 : i64} {
  func.func @_policy_mlp_kernel(%arg0: i32, %arg1: memref<512x4xf32, #tpu.memory_space<vmem>>, %arg2: memref<3x128x128xf32, #tpu.memory_space<vmem>>, %arg3: memref<3x1x128xf32, #tpu.memory_space<vmem>>, %arg4: memref<512x128xf32, #tpu.memory_space<vmem>>) attributes {dimension_semantics = [#tpu.dimension_semantics<parallel>], iteration_bounds = array<i64: 1>, scalar_prefetch = 0 : i64, scratch_operands = 0 : i64, tpu.core_type = #tpu.core_type<tc>, window_params = [{transform_indices = @transform_0, window_bounds = array<i64: 512, 4>}, {pipeline_mode = #tpu.pipeline_mode<synchronous>, transform_indices = @transform_1, window_bounds = array<i64: 3, 128, 128>}, {pipeline_mode = #tpu.pipeline_mode<synchronous>, transform_indices = @transform_2, window_bounds = array<i64: 3, 1, 128>}, {transform_indices = @transform_3, window_bounds = array<i64: 512, 128>}]} {
    %c0 = arith.constant 0 : index
    %c0_0 = arith.constant 0 : index
    %0 = vector.load %arg1[%c0, %c0_0] : memref<512x4xf32, #tpu.memory_space<vmem>>, vector<512x4xf32>
    %c0_1 = arith.constant 0 : index
    %c0_2 = arith.constant 0 : index
    %c0_3 = arith.constant 0 : index
    %1 = vector.load %arg2[%c0_1, %c0_2, %c0_3] : memref<3x128x128xf32, #tpu.memory_space<vmem>>, vector<1x4x128xf32>
    %2 = vector.shape_cast %1 : vector<1x4x128xf32> to vector<4x128xf32>
    %cst = arith.constant dense<0.000000e+00> : vector<512x128xf32>
    %3 = tpu.matmul %0, %2, %cst {dimension_numbers = #tpu.dot_dimension_numbers<[1], [0], [0], [1], [0, 0, 1, 1], [], []>} : vector<512x4xf32>, vector<4x128xf32>, vector<512x128xf32> -> vector<512x128xf32>
    %c0_4 = arith.constant 0 : index
    %c0_5 = arith.constant 0 : index
    %c0_6 = arith.constant 0 : index
    %4 = vector.load %arg3[%c0_4, %c0_5, %c0_6] : memref<3x1x128xf32, #tpu.memory_space<vmem>>, vector<1x1x128xf32>
    %5 = vector.shape_cast %4 : vector<1x1x128xf32> to vector<1x128xf32>
    %6 = vector.broadcast %5 : vector<1x128xf32> to vector<512x128xf32>
    %7 = arith.addf %3, %6 : vector<512x128xf32>
    %cst_7 = arith.constant 0.000000e+00 : f32
    %8 = vector.broadcast %cst_7 : f32 to vector<512x128xf32>
    %9 = arith.maximumf %7, %8 : vector<512x128xf32>
    %c1 = arith.constant 1 : index
    %c0_8 = arith.constant 0 : index
    %c0_9 = arith.constant 0 : index
    %10 = vector.load %arg2[%c1, %c0_8, %c0_9] : memref<3x128x128xf32, #tpu.memory_space<vmem>>, vector<1x128x128xf32>
    %11 = vector.shape_cast %10 : vector<1x128x128xf32> to vector<128x128xf32>
    %cst_10 = arith.constant dense<0.000000e+00> : vector<512x128xf32>
    %12 = tpu.matmul %9, %11, %cst_10 {dimension_numbers = #tpu.dot_dimension_numbers<[1], [0], [0], [1], [0, 0, 1, 1], [], []>} : vector<512x128xf32>, vector<128x128xf32>, vector<512x128xf32> -> vector<512x128xf32>
    %c1_11 = arith.constant 1 : index
    %c0_12 = arith.constant 0 : index
    %c0_13 = arith.constant 0 : index
    %13 = vector.load %arg3[%c1_11, %c0_12, %c0_13] : memref<3x1x128xf32, #tpu.memory_space<vmem>>, vector<1x1x128xf32>
    %14 = vector.shape_cast %13 : vector<1x1x128xf32> to vector<1x128xf32>
    %15 = vector.broadcast %14 : vector<1x128xf32> to vector<512x128xf32>
    %16 = arith.addf %12, %15 : vector<512x128xf32>
    %cst_14 = arith.constant 0.000000e+00 : f32
    %17 = vector.broadcast %cst_14 : f32 to vector<512x128xf32>
    %18 = arith.maximumf %16, %17 : vector<512x128xf32>
    %c2 = arith.constant 2 : index
    %c0_15 = arith.constant 0 : index
    %c0_16 = arith.constant 0 : index
    %19 = vector.load %arg2[%c2, %c0_15, %c0_16] : memref<3x128x128xf32, #tpu.memory_space<vmem>>, vector<1x128x128xf32>
    %20 = vector.shape_cast %19 : vector<1x128x128xf32> to vector<128x128xf32>
    %cst_17 = arith.constant dense<0.000000e+00> : vector<512x128xf32>
    %21 = tpu.matmul %18, %20, %cst_17 {dimension_numbers = #tpu.dot_dimension_numbers<[1], [0], [0], [1], [0, 0, 1, 1], [], []>} : vector<512x128xf32>, vector<128x128xf32>, vector<512x128xf32> -> vector<512x128xf32>
    %c2_18 = arith.constant 2 : index
    %c0_19 = arith.constant 0 : index
    %c0_20 = arith.constant 0 : index
    %22 = vector.load %arg3[%c2_18, %c0_19, %c0_20] : memref<3x1x128xf32, #tpu.memory_space<vmem>>, vector<1x1x128xf32>
    %23 = vector.shape_cast %22 : vector<1x1x128xf32> to vector<1x128xf32>
    %24 = vector.broadcast %23 : vector<1x128xf32> to vector<512x128xf32>
    %25 = arith.addf %21, %24 : vector<512x128xf32>
    %cst_21 = arith.constant dense<0xFF800000> : vector<512xf32>
    %26 = vector.multi_reduction <maximumf>, %25, %cst_21 [1] : vector<512x128xf32> to vector<512xf32>
    %27 = vector.shape_cast %26 : vector<512xf32> to vector<512x1xf32>
    %28 = vector.broadcast %27 : vector<512x1xf32> to vector<512x128xf32>
    %29 = arith.subf %25, %28 : vector<512x128xf32>
    %30 = math.exp %29 : vector<512x128xf32>
    %cst_22 = arith.constant dense<0.000000e+00> : vector<512xf32>
    %31 = vector.multi_reduction <add>, %30, %cst_22 [1] : vector<512x128xf32> to vector<512xf32>
    %32 = vector.shape_cast %31 : vector<512xf32> to vector<512x1xf32>
    %33 = vector.broadcast %32 : vector<512x1xf32> to vector<512x128xf32>
    %34 = arith.divf %30, %33 : vector<512x128xf32>
    %c0_23 = arith.constant 0 : index
    %c0_24 = arith.constant 0 : index
    %35 = vector.load %arg4[%c0_23, %c0_24] : memref<512x128xf32, #tpu.memory_space<vmem>>, vector<512x128xf32>
    tpu.vector_store %arg4[%c0_23, %c0_24], %34 {strides = array<i32>} : memref<512x128xf32, #tpu.memory_space<vmem>>, vector<512x128xf32>,
    return
  }
  func.func @transform_0(%arg0: i32) -> (i32, i32) {
    %c0_i32 = arith.constant 0 : i32
    %c0_i32_0 = arith.constant 0 : i32
    return %arg0, %c0_i32 : i32, i32
  }
  func.func @transform_1(%arg0: i32) -> (i32, i32, i32) {
    %c0_i32 = arith.constant 0 : i32
    %c0_i32_0 = arith.constant 0 : i32
    %c0_i32_1 = arith.constant 0 : i32
    %c0_i32_2 = arith.constant 0 : i32
    return %c0_i32, %c0_i32_0, %c0_i32_1 : i32, i32, i32
  }
  func.func @transform_2(%arg0: i32) -> (i32, i32, i32) {
    %c0_i32 = arith.constant 0 : i32
    %c0_i32_0 = arith.constant 0 : i32
    %c0_i32_1 = arith.constant 0 : i32
    %c0_i32_2 = arith.constant 0 : i32
    return %c0_i32, %c0_i32_0, %c0_i32_1 : i32, i32, i32
  }
  func.func @transform_3(%arg0: i32) -> (i32, i32) {
    %c0_i32 = arith.constant 0 : i32
    %c0_i32_0 = arith.constant 0 : i32
    return %arg0, %c0_i32 : i32, i32
  }
}

</mosaic_0001>

<bundles_post_ra>
// kernel: policy_forward.1
= control target key start
LH: loop header
LB: loop body
LE: loop exit
PB: predicated region body
PF: predicated region fallthrough
CT: control target
= control target key end

     0   :  { %vm279_vm0 = vcmask 1043456   ;;  %vm86_vm1 = vcmask 31744   ;;  %s4536_s1 = inlined_call_operand.vmem [shape: f32[3,128,128], index: 1, kind: input, shape index: {}]   ;;  %s4537_s0 = inlined_call_operand.vmem [shape: f32[512,4], index: 0, kind: input, shape index: {}]   ;;  %s4538_s2 = inlined_call_operand.vmem [shape: f32[3,1,128], index: 2, kind: input, shape index: {}]   ;;  %s4539_s3 = inlined_call_operand.vmem [shape: f32[512,128], index: 3, kind: output, shape index: {}]  }
   0x1   :  { %v78_v0 = vld [vmem:[%s4536_s1] sm:$0xf]  ;;  %v15_v2 = vld [vmem:[%s4537_s0 + $0x8] sm:$0xff]  ;;  %v16_v3 = vld [vmem:[%s4537_s0 + $0x10] sm:$0xff] }
   0x2   :  { %v14_v1 = vld [vmem:[%s4537_s0] sm:$0xff]  ;;  %2587 = vmatprep.subr.msk.mxu0 %vm279_vm0, %v78_v0  ;;  %2941 = vmatprep.subr.msk.mxu1 %vm279_vm0, %v78_v0  ;;  %v17_v4 = vld [vmem:[%s4537_s0 + $0x18] sm:$0xff]  ;;  %v19_v6 = vld [vmem:[%s4537_s0 + $0x28] sm:$0xff] }
   0x3   :  { %2589 = vmatprep.mubr.msk.f32.mxu0 %vm86_vm1, %v14_v1  ;;  %2588 = vmatpush3.msk.msra.mxu0 %vm279_vm0, %v78_v0  ;;  %v18_v5 = vld [vmem:[%s4537_s0 + $0x20] sm:$0xff]  ;;  %v20_v7 = vld [vmem:[%s4537_s0 + $0x30] sm:$0xff]  ;;  %v47_v9 = vld [vmem:[%s4537_s0 + $0x108] sm:$0xff] }
   0x4   :  { %2590 = vmatmul.mubr.msk.f32.vlgmr.msra.gmra.mxu0 %vm86_vm1, %v15_v2  ;;  %2942 = vmatpush3.msk.msra.mxu1 %vm279_vm0, %v78_v0  ;;  %v46_v8 = vld [vmem:[%s4537_s0 + $0x100] sm:$0xff]  ;;  %v48_v10 = vld [vmem:[%s4537_s0 + $0x110] sm:$0xff]  ;;  %v21_v11 = vld [vmem:[%s4537_s0 + $0x38] sm:$0xff] }
   0x5   :  { %2592 = vmatprep.mubr.msk.f32.mxu0 %vm86_vm1, %v16_v3  ;;  %2637 = vmatprep.mubr.msk.f32.mxu1 %vm86_vm1, %v46_v8  ;;  %v22_v12 = vld [vmem:[%s4537_s0 + $0x40] sm:$0xff]  ;;  %v49_v13 = vld [vmem:[%s4537_s0 + $0x118] sm:$0xff]  ;;  %v23_v15 = vld [vmem:[%s4537_s0 + $0x48] sm:$0xff] }
   0x6   :  { %2638 = vmatmul.mubr.msk.f32.vlgmr.msra.gmra.mxu1 %vm86_vm1, %v47_v9  ;;  %v50_v14 = vld [vmem:[%s4537_s0 + $0x120] sm:$0xff]  ;;  %v24_v16 = vld [vmem:[%s4537_s0 + $0x50] sm:$0xff]  ;;  %v51_v17 = vld [vmem:[%s4537_s0 + $0x128] sm:$0xff] }
   0x7   :  { %2640 = vmatprep.mubr.msk.f32.mxu1 %vm86_vm1, %v48_v10  ;;  %v52_v18 = vld [vmem:[%s4537_s0 + $0x130] sm:$0xff]  ;;  %v25_v19 = vld [vmem:[%s4537_s0 + $0x58] sm:$0xff]  ;;  %v26_v20 = vld [vmem:[%s4537_s0 + $0x60] sm:$0xff] }
   0x8   :  { %2593 = vmatmul.mubr.msk.f32.gmra.mxu0 %vm86_vm1, %v17_v4  ;;  %v2341_v21 = vld [vmem:[%s4536_s1 + $0xf8] sm:$0xff]  ;;  %v2340_v23 = vld [vmem:[%s4536_s1 + $0xf0] sm:$0xff]  ;;  %v54_v24 = vld [vmem:[%s4537_s0 + $0x140] sm:$0xff] }
   0x9   :  { %2595 = vmatprep.mubr.msk.f32.mxu0 %vm86_vm1, %v18_v5  ;;  %v53_v22 = vld [vmem:[%s4537_s0 + $0x138] sm:$0xff]  ;;  %2685 = vmatprep.subr.mxu1 %v2341_v21  ;;  %v27_v25 = vld [vmem:[%s4537_s0 + $0x68] sm:$0xff]  ;;  %v28_v27 = vld [vmem:[%s4537_s0 + $0x70] sm:$0xff] }
   0xa   :  { %2641 = vmatmul.mubr.msk.f32.gmra.mxu1 %vm86_vm1, %v49_v13  ;;  %v2339_v26 = vld [vmem:[%s4536_s1 + $0xe8] sm:$0xff]  ;;  %v2338_v29 = vld [vmem:[%s4536_s1 + $0xe0] sm:$0xff]  ;;  %v56_v30 = vld [vmem:[%s4537_s0 + $0x150] sm:$0xff] }
   0xb   :  { %2643 = vmatprep.mubr.msk.f32.mxu1 %vm86_vm1, %v50_v14  ;;  %2686 = vmatpush3.msra.mxu1 %v2341_v21  ;;  %v55_v28 = vld [vmem:[%s4537_s0 + $0x148] sm:$0xff]  ;;  %v29_v31 = vld [vmem:[%s4537_s0 + $0x78] sm:$0xff]  ;;  %v30_v33 = vld [vmem:[%s4537_s0 + $0x80] sm:$0xff] }
   0xc   :  { %2596 = vmatmul.mubr.msk.f32.gmra.mxu0 %vm86_vm1, %v19_v6  ;;  %2687 = vmatprep.subr.mxu1 %v2340_v23  ;;  %v2337_v32 = vld [vmem:[%s4536_s1 + $0xd8] sm:$0xff]  ;;  %v2336_v35 = vld [vmem:[%s4536_s1 + $0xd0] sm:$0xff]  ;;  %v58_v36 = vld [vmem:[%s4537_s0 + $0x160] sm:$0xff] }
   0xd   :  { %2598 = vmatprep.mubr.msk.f32.mxu0 %vm86_vm1, %v20_v7  ;;  %2688 = vmatpush3.msra.mxu1 %v2340_v23  ;;  %v57_v34 = vld [vmem:[%s4537_s0 + $0x158] sm:$0xff]  ;;  %v31_v37 = vld [vmem:[%s4537_s0 + $0x88] sm:$0xff]  ;;  %v32_v39 = vld [vmem:[%s4537_s0 + $0x90] sm:$0xff] }
   0xe   :  { %2644 = vmatmul.mubr.msk.f32.gmra.mxu1 %vm86_vm1, %v51_v17  ;;  %2689 = vmatprep.subr.mxu1 %v2339_v26  ;;  %v2335_v38 = vld [vmem:[%s4536_s1 + $0xc8] sm:$0xff]  ;;  %v2334_v41 = vld [vmem:[%s4536_s1 + $0xc0] sm:$0xff]  ;;  %v60_v42 = vld [vmem:[%s4537_s0 + $0x170] sm:$0xff] }
   0xf   :  { %2646 = vmatprep.mubr.msk.f32.mxu1 %vm86_vm1, %v52_v18  ;;  %2690 = vmatpush3.msra.mxu1 %v2339_v26  ;;  %v59_v40 = vld [vmem:[%s4537_s0 + $0x168] sm:$0xff]  ;;  %v33_v43 = vld [vmem:[%s4537_s0 + $0x98] sm:$0xff]  ;;  %v34_v45 = vld [vmem:[%s4537_s0 + $0xa0] sm:$0xff] }
  0x10   :  { %2599 = vmatmul.mubr.msk.f32.gmra.mxu0 %vm86_vm1, %v21_v11  ;;  %2691 = vmatprep.subr.mxu1 %v2338_v29  ;;  %v2333_v44 = vld [vmem:[%s4536_s1 + $0xb8] sm:$0xff]  ;;  %v2332_v47 = vld [vmem:[%s4536_s1 + $0xb0] sm:$0xff]  ;;  %v62_v48 = vld [vmem:[%s4537_s0 + $0x180] sm:$0xff] }
  0x11   :  { %2601 = vmatprep.mubr.msk.f32.mxu0 %vm86_vm1, %v22_v12  ;;  %2692 = vmatpush3.msra.mxu1 %v2338_v29  ;;  %v61_v46 = vld [vmem:[%s4537_s0 + $0x178] sm:$0xff]  ;;  %v35_v49 = vld [vmem:[%s4537_s0 + $0xa8] sm:$0xff]  ;;  %v36_v51 = vld [vmem:[%s4537_s0 + $0xb0] sm:$0xff] }
  0x12   :  { %2647 = vmatmul.mubr.msk.f32.gmra.mxu1 %vm86_vm1, %v53_v22  ;;  %2693 = vmatprep.subr.mxu1 %v2337_v32  ;;  %v2331_v50 = vld [vmem:[%s4536_s1 + $0xa8] sm:$0xff]  ;;  %v2330_v53 = vld [vmem:[%s4536_s1 + $0xa0] sm:$0xff]  ;;  %v64_v54 = vld [vmem:[%s4537_s0 + $0x190] sm:$0xff] }
  0x13   :  { %2649 = vmatprep.mubr.msk.f32.mxu1 %vm86_vm1, %v54_v24  ;;  %2694 = vmatpush3.msra.mxu1 %v2337_v32  ;;  %v63_v52 = vld [vmem:[%s4537_s0 + $0x188] sm:$0xff]  ;;  %v37_v55 = vld [vmem:[%s4537_s0 + $0xb8] sm:$0xff]  ;;  %v38_v57 = vld [vmem:[%s4537_s0 + $0xc0] sm:$0xff] }
  0x14   :  { %2602 = vmatmul.mubr.msk.f32.gmra.mxu0 %vm86_vm1, %v23_v15  ;;  %2695 = vmatprep.subr.mxu1 %v2336_v35  ;;  %v2329_v56 = vld [vmem:[%s4536_s1 + $0x98] sm:$0xff]  ;;  %v2328_v59 = vld [vmem:[%s4536_s1 + $0x90] sm:$0xff]  ;;  %v66_v60 = vld [vmem:[%s4537_s0 + $0x1a0] sm:$0xff] }
  0x15   :  { %2604 = vmatprep.mubr.msk.f32.mxu0 %vm86_vm1, %v24_v16  ;;  %2696 = vmatpush3.msra.mxu1 %v2336_v35  ;;  %v65_v58 = vld [vmem:[%s4537_s0 + $0x198] sm:$0xff]  ;;  %v39_v61 = vld [vmem:[%s4537_s0 + $0xc8] sm:$0xff]  ;;  %v40_v63 = vld [vmem:[%s4537_s0 + $0xd0] sm:$0xff] }
  0x16   :  { %2650 = vmatmul.mubr.msk.f32.gmra.mxu1 %vm86_vm1, %v55_v28  ;;  %2697 = vmatprep.subr.mxu1 %v2335_v38  ;;  %v2327_v62 = vld [vmem:[%s4536_s1 + $0x88] sm:$0xff]  ;;  %v68_v1 = vld [vmem:[%s4537_s0 + $0x1b0] sm:$0xff]  ;;  %v41_v2 = vld [vmem:[%s4537_s0 + $0xd8] sm:$0xff] }
  0x17   :  { %2652 = vmatprep.mubr.msk.f32.mxu1 %vm86_vm1, %v56_v30  ;;  %2698 = vmatpush3.msra.mxu1 %v2335_v38  ;;  %v67_v0 = vld [vmem:[%s4537_s0 + $0x1a8] sm:$0xff]  ;;  %v42_v3 = vld [vmem:[%s4537_s0 + $0xe0] sm:$0xff]  ;;  %v69_v4 = vld [vmem:[%s4537_s0 + $0x1b8] sm:$0xff] }
  0x18   :  { %2605 = vmatmul.mubr.msk.f32.gmra.mxu0 %vm86_vm1, %v25_v19  ;;  %2699 = vmatprep.subr.mxu1 %v2334_v41  ;;  %v70_v5 = vld [vmem:[%s4537_s0 + $0x1c0] sm:$0xff]  ;;  %v43_v6 = vld [vmem:[%s4537_s0 + $0xe8] sm:$0xff]  ;;  %v44_v7 = vld [vmem:[%s4537_s0 + $0xf0] sm:$0xff] }
  0x19   :  { %2607 = vmatprep.mubr.msk.f32.mxu0 %vm86_vm1, %v26_v20  ;;  %2700 = vmatpush3.msra.mxu1 %v2334_v41  ;;  %v71_v8 = vld [vmem:[%s4537_s0 + $0x1c8] sm:$0xff]  ;;  %v72_v9 = vld [vmem:[%s4537_s0 + $0x1d0] sm:$0xff]  ;;  %v45_v10 = vld [vmem:[%s4537_s0 + $0xf8] sm:$0xff] }
  0x1a   :  { %2653 = vmatmul.mubr.msk.f32.gmra.mxu1 %vm86_vm1, %v57_v34  ;;  %2701 = vmatprep.subr.mxu1 %v2333_v44  ;;  %v73_v11 = vld [vmem:[%s4537_s0 + $0x1d8] sm:$0xff]  ;;  %v74_v12 = vld [vmem:[%s4537_s0 + $0x1e0] sm:$0xff]  ;;  %v75_v13 = vld [vmem:[%s4537_s0 + $0x1e8] sm:$0xff] }
  0x1b   :  { %2655 = vmatprep.mubr.msk.f32.mxu1 %vm86_vm1, %v58_v36  ;;  %2702 = vmatpush3.msra.mxu1 %v2333_v44  ;;  %v76_v14 = vld [vmem:[%s4537_s0 + $0x1f0] sm:$0xff]  ;;  %v77_v15 = vld [vmem:[%s4537_s0 + $0x1f8] sm:$0xff]  ;;  %v2326_v16 = vld [vmem:[%s4536_s1 + $0x80] sm:$0xff] }
  0x1c   :  { %2608 = vmatmul.mubr.msk.f32.gmra.mxu0 %vm86_vm1, %v27_v25  ;;  %2703 = vmatprep.subr.mxu1 %v2332_v47  ;;  %v3529_v17 = vld [vmem:[%s4538_s2] ss:$0 sm:$0xff]  ;;  %v2359_v23 = vld [vmem:[%s4536_s1 + $0x178] sm:$0xff]  ;;  %v2358_v24 = vld [vmem:[%s4536_s1 + $0x170] sm:$0xff] }
  0x1d   :  { %2610 = vmatprep.mubr.msk.f32.mxu0 %vm86_vm1, %v28_v27  ;;  %2704 = vmatpush3.msra.mxu1 %v2332_v47  ;;  %v2357_v29 = vld [vmem:[%s4536_s1 + $0x168] sm:$0xff]  ;;  %v2356_v32 = vld [vmem:[%s4536_s1 + $0x160] sm:$0xff]  ;;  %v2355_v38 = vld [vmem:[%s4536_s1 + $0x158] sm:$0xff] }
  0x1e   :  { %2656 = vmatmul.mubr.msk.f32.gmra.mxu1 %vm86_vm1, %v59_v40  ;;  %2705 = vmatprep.subr.mxu1 %v2331_v50 }
  0x1f   :  { %2658 = vmatprep.mubr.msk.f32.mxu1 %vm86_vm1, %v60_v42  ;;  %2706 = vmatpush3.msra.mxu1 %v2331_v50 }
  0x20   :  { %2611 = vmatmul.mubr.msk.f32.gmra.mxu0 %vm86_vm1, %v29_v31  ;;  %2707 = vmatprep.subr.mxu1 %v2330_v53 }
  0x21   :  { %2613 = vmatprep.mubr.msk.f32.mxu0 %vm86_vm1, %v30_v33  ;;  %2708 = vmatpush3.msra.mxu1 %v2330_v53  ;;  %v2352_v53 = vld [vmem:[%s4536_s1 + $0x140] sm:$0xff] }
  0x22   :  { %2659 = vmatmul.mubr.msk.f32.gmra.mxu1 %vm86_vm1, %v61_v46  ;;  %2709 = vmatprep.subr.mxu1 %v2329_v56 }
  0x23   :  { %2661 = vmatprep.mubr.msk.f32.mxu1 %vm86_vm1, %v62_v48  ;;  %2710 = vmatpush3.msra.mxu1 %v2329_v56  ;;  %v2353_v48 = vld [vmem:[%s4536_s1 + $0x148] sm:$0xff] }
  0x24   :  { %2614 = vmatmul.mubr.msk.f32.gmra.mxu0 %vm86_vm1, %v31_v37  ;;  %2711 = vmatprep.subr.mxu1 %v2328_v59 }
  0x25   :  { %2616 = vmatprep.mubr.msk.f32.mxu0 %vm86_vm1, %v32_v39  ;;  %2712 = vmatpush3.msra.mxu1 %v2328_v59 }
  0x26   :  { %2662 = vmatmul.mubr.msk.f32.gmra.mxu1 %vm86_vm1, %v63_v52  ;;  %2713 = vmatprep.subr.mxu1 %v2327_v62 }
  0x27   :  { %2664 = vmatprep.mubr.msk.f32.mxu1 %vm86_vm1, %v64_v54  ;;  %2714 = vmatpush3.msra.mxu1 %v2327_v62 }
  0x28   :  { %2617 = vmatmul.mubr.msk.f32.gmra.mxu0 %vm86_vm1, %v33_v43  ;;  %2715 = vmatprep.subr.mxu1 %v2326_v16  ;;  %v2354_v43 = vld [vmem:[%s4536_s1 + $0x150] sm:$0xff] }
  0x29   :  { %2619 = vmatprep.mubr.msk.f32.mxu0 %vm86_vm1, %v34_v45  ;;  %2716 = vmatpush3.msra.mxu1 %v2326_v16 }
  0x2a   :  { %2665 = vmatmul.mubr.msk.f32.gmra.mxu1 %vm86_vm1, %v65_v58  ;;  %2813 = vmatprep.subr.mxu0 %v2359_v23  ;;  %v2351_v58 = vld [vmem:[%s4536_s1 + $0x138] sm:$0xff] }
  0x2b   :  { %2667 = vmatprep.mubr.msk.f32.mxu1 %vm86_vm1, %v66_v60  ;;  %2814 = vmatpush3.msra.mxu0 %v2359_v23 }
  0x2c   :  { %2620 = vmatmul.mubr.msk.f32.gmra.mxu0 %vm86_vm1, %v35_v49  ;;  %2815 = vmatprep.subr.mxu0 %v2358_v24 }
  0x2d   :  { %2622 = vmatprep.mubr.msk.f32.mxu0 %vm86_vm1, %v36_v51  ;;  %2816 = vmatpush3.msra.mxu0 %v2358_v24  ;;  %v2345_v24 = vld [vmem:[%s4536_s1 + $0x108] sm:$0xff] }
  0x2e   :  { %2668 = vmatmul.mubr.msk.f32.gmra.mxu1 %vm86_vm1, %v67_v0  ;;  %2817 = vmatprep.subr.mxu0 %v2357_v29 }
  0x2f   :  { %2670 = vmatprep.mubr.msk.f32.mxu1 %vm86_vm1, %v68_v1  ;;  %2818 = vmatpush3.msra.mxu0 %v2357_v29 }
  0x30   :  { %2623 = vmatmul.mubr.msk.f32.gmra.mxu0 %vm86_vm1, %v37_v55  ;;  %2819 = vmatprep.subr.mxu0 %v2356_v32 }
  0x31   :  { %2625 = vmatprep.mubr.msk.f32.mxu0 %vm86_vm1, %v38_v57  ;;  %2820 = vmatpush3.msra.mxu0 %v2356_v32 }
  0x32   :  { %2671 = vmatmul.mubr.msk.f32.gmra.mxu1 %vm86_vm1, %v69_v4  ;;  %2821 = vmatprep.subr.mxu0 %v2355_v38  ;;  %v2349_v4 = vld [vmem:[%s4536_s1 + $0x128] sm:$0xff] }
  0x33   :  { %2673 = vmatprep.mubr.msk.f32.mxu1 %vm86_vm1, %v70_v5  ;;  %2822 = vmatpush3.msra.mxu0 %v2355_v38 }
  0x34   :  { %2626 = vmatmul.mubr.msk.f32.gmra.mxu0 %vm86_vm1, %v39_v61  ;;  %2823 = vmatprep.subr.mxu0 %v2354_v43 }
  0x35   :  { %2628 = vmatprep.mubr.msk.f32.mxu0 %vm86_vm1, %v40_v63  ;;  %2824 = vmatpush3.msra.mxu0 %v2354_v43  ;;  %v2350_v63 = vld [vmem:[%s4536_s1 + $0x130] sm:$0xff] }
  0x36   :  { %2674 = vmatmul.mubr.msk.f32.gmra.mxu1 %vm86_vm1, %v71_v8  ;;  %2825 = vmatprep.subr.mxu0 %v2353_v48 }
  0x37   :  { %2676 = vmatprep.mubr.msk.f32.mxu1 %vm86_vm1, %v72_v9  ;;  %2826 = vmatpush3.msra.mxu0 %v2353_v48  ;;  %v2348_v9 = vld [vmem:[%s4536_s1 + $0x120] sm:$0xff] }
  0x38   :  { %2629 = vmatmul.mubr.msk.f32.gmra.mxu0 %vm86_vm1, %v41_v2  ;;  %2827 = vmatprep.subr.mxu0 %v2352_v53 }
  0x39   :  { %2631 = vmatprep.mubr.msk.f32.mxu0 %vm86_vm1, %v42_v3  ;;  %2828 = vmatpush3.msra.mxu0 %v2352_v53 }
  0x3a   :  { %2677 = vmatmul.mubr.msk.f32.gmra.mxu1 %vm86_vm1, %v73_v11  ;;  %2829 = vmatprep.subr.mxu0 %v2351_v58 }
  0x3b   :  { %2679 = vmatprep.mubr.msk.f32.mxu1 %vm86_vm1, %v74_v12  ;;  %2830 = vmatpush3.msra.mxu0 %v2351_v58 }
  0x3c   :  { %2632 = vmatmul.mubr.msk.f32.gmra.mxu0 %vm86_vm1, %v43_v6  ;;  %2831 = vmatprep.subr.mxu0 %v2350_v63 }
  0x3d   :  { %2634 = vmatprep.mubr.msk.f32.mxu0 %vm86_vm1, %v44_v7  ;;  %2832 = vmatpush3.msra.mxu0 %v2350_v63 }
  0x3e   :  { %2680 = vmatmul.mubr.msk.f32.gmra.mxu1 %vm86_vm1, %v75_v13  ;;  %2833 = vmatprep.subr.mxu0 %v2349_v4 }
  0x3f   :  { %2682 = vmatprep.mubr.msk.f32.mxu1 %vm86_vm1, %v76_v14  ;;  %2834 = vmatpush3.msra.mxu0 %v2349_v4  ;;  %v2347_v14 = vld [vmem:[%s4536_s1 + $0x118] sm:$0xff] }
  0x40   :  { %2635 = vmatmul.mubr.msk.f32.gmra.mxu0 %vm86_vm1, %v45_v10  ;;  %2835 = vmatprep.subr.mxu0 %v2348_v9 }
  0x41   :  { %2836 = vmatpush3.msra.mxu0 %v2348_v9 }
  0x42   :  { %2683 = vmatmul.mubr.msk.f32.gmra.mxu1 %vm86_vm1, %v77_v15  ;;  %2837 = vmatprep.subr.mxu0 %v2347_v14 }
  0x43   :  { %2838 = vmatpush3.msra.mxu0 %v2347_v14 }
  0xc4   :  { %v2591_v18 = vpop.f32.mrf.mxu0 }
  0xc5   :  { %v355_v19 = vadd.f32 %v2591_v18, %v3529_v17 }
  0xc6   :  { %v349_v20 = vpop.f32.mrf.mxu0  ;;  %v3548_v37 = vpop.f32.mrf.mxu1 }
  0xc7   :  { %v350_v21 = vadd.f32 %v3529_v17, %v349_v20  ;;  %v669_v26 = vmax.f32 %v355_v19, 0.0  ;;  %v2346_v19 = vld [vmem:[%s4536_s1 + $0x110] sm:$0xff] }
  0xc8   :  { %v2594_v22 = vpop.f32.mrf.mxu0  ;;  %v3554_v42 = vpop.f32.mrf.mxu1  ;;  %2839 = vmatprep.subr.mxu0 %v2346_v19 }
  0xc9   :  { %v668_v25 = vmax.f32 %v350_v21, 0.0  ;;  %v365_v27 = vadd.f32 %v2594_v22, %v3529_v17  ;;  %2840 = vmatpush3.msra.mxu0 %v2346_v19 }
  0xca   :  { %v359_v28 = vpop.f32.mrf.mxu0  ;;  %v3560_v47 = vpop.f32.mrf.mxu1  ;;  %2841 = vmatprep.subr.mxu0 %v2345_v24 }
  0xcb   :  { %v360_v30 = vadd.f32 %v3529_v17, %v359_v28  ;;  %2717 = vmatprep.mubr.f32.mxu1 %v668_v25  ;;  %v671_v35 = vmax.f32 %v365_v27, 0.0  ;;  %2842 = vmatpush3.msra.mxu0 %v2345_v24 }
  0xcc   :  { %v2597_v31 = vpop.f32.mrf.mxu0  ;;  %2718 = vmatmul.mubr.f32.vlgmr.msra.gmra.mxu1 %v669_v26  ;;  %v3566_v52 = vpop.f32.mrf.mxu1 }
  0xcd   :  { %v670_v33 = vmax.f32 %v360_v30, 0.0  ;;  %v375_v34 = vadd.f32 %v2597_v31, %v3529_v17 }
  0xce   :  { %v369_v36 = vpop.f32.mrf.mxu0  ;;  %v3572_v57 = vpop.f32.mrf.mxu1 }
  0xcf   :  { %v370_v39 = vadd.f32 %v3529_v17, %v369_v36  ;;  %2720 = vmatprep.mubr.f32.mxu1 %v670_v33  ;;  %v673_v40 = vmax.f32 %v375_v34, 0.0 }
  0xd0   :  { %v2600_v41 = vpop.f32.mrf.mxu0  ;;  %2721 = vmatmul.mubr.f32.gmra.mxu1 %v671_v35  ;;  %v3578_v62 = vpop.f32.mrf.mxu1 }
  0xd1   :  { %v672_v44 = vmax.f32 %v370_v39, 0.0  ;;  %v385_v45 = vadd.f32 %v2600_v41, %v3529_v17 }
  0xd2   :  { %v379_v46 = vpop.f32.mrf.mxu0  ;;  %v3584_v3 = vpop.f32.mrf.mxu1 }
  0xd3   :  { %v380_v49 = vadd.f32 %v3529_v17, %v379_v46  ;;  %2723 = vmatprep.mubr.f32.mxu1 %v672_v44  ;;  %v675_v50 = vmax.f32 %v385_v45, 0.0 }
  0xd4   :  { %v2603_v51 = vpop.f32.mrf.mxu0  ;;  %2724 = vmatmul.mubr.f32.gmra.mxu1 %v673_v40  ;;  %v3590_v8 = vpop.f32.mrf.mxu1 }
  0xd5   :  { %v674_v54 = vmax.f32 %v380_v49, 0.0  ;;  %v395_v55 = vadd.f32 %v2603_v51, %v3529_v17 }
  0xd6   :  { %v389_v56 = vpop.f32.mrf.mxu0  ;;  %v3596_v13 = vpop.f32.mrf.mxu1 }
  0xd7   :  { %v390_v59 = vadd.f32 %v3529_v17, %v389_v56  ;;  %2726 = vmatprep.mubr.f32.mxu1 %v674_v54  ;;  %v677_v60 = vmax.f32 %v395_v55, 0.0 }
  0xd8   :  { %v2606_v61 = vpop.f32.mrf.mxu0  ;;  %2727 = vmatmul.mubr.f32.gmra.mxu1 %v675_v50  ;;  %v3606_v23 = vpop.f32.mrf.mxu1 }
  0xd9   :  { %v676_v0 = vmax.f32 %v390_v59, 0.0  ;;  %v405_v1 = vadd.f32 %v2606_v61, %v3529_v17 }
  0xda   :  { %v399_v2 = vpop.f32.mrf.mxu0  ;;  %v3613_v31 = vpop.f32.mrf.mxu1 }
  0xdb   :  { %v400_v5 = vadd.f32 %v3529_v17, %v399_v2  ;;  %2729 = vmatprep.mubr.f32.mxu1 %v676_v0  ;;  %v679_v6 = vmax.f32 %v405_v1, 0.0 }
  0xdc   :  { %v2609_v7 = vpop.f32.mrf.mxu0  ;;  %2730 = vmatmul.mubr.f32.gmra.mxu1 %v677_v60  ;;  %v3617_v39 = vpop.f32.mrf.mxu1 }
  0xdd   :  { %v678_v10 = vmax.f32 %v400_v5, 0.0  ;;  %v415_v11 = vadd.f32 %v2609_v7, %v3529_v17 }
  0xde   :  { %v409_v12 = vpop.f32.mrf.mxu0  ;;  %v3621_v48 = vpop.f32.mrf.mxu1 }
  0xdf   :  { %v410_v15 = vadd.f32 %v3529_v17, %v409_v12  ;;  %2732 = vmatprep.mubr.f32.mxu1 %v678_v10  ;;  %v681_v16 = vmax.f32 %v415_v11, 0.0 }
  0xe0   :  { %v2612_v18 = vpop.f32.mrf.mxu0  ;;  %2733 = vmatmul.mubr.f32.gmra.mxu1 %v679_v6  ;;  %v3625_v56 = vpop.f32.mrf.mxu1 }
  0xe1   :  { %v680_v20 = vmax.f32 %v410_v15, 0.0  ;;  %v425_v21 = vadd.f32 %v2612_v18, %v3529_v17 }
  0xe2   :  { %v419_v22 = vpop.f32.mrf.mxu0  ;;  %v3629_v1 = vpop.f32.mrf.mxu1 }
  0xe3   :  { %v420_v25 = vadd.f32 %v3529_v17, %v419_v22  ;;  %2735 = vmatprep.mubr.f32.mxu1 %v680_v20  ;;  %v683_v26 = vmax.f32 %v425_v21, 0.0 }
  0xe4   :  { %v2615_v27 = vpop.f32.mrf.mxu0  ;;  %2736 = vmatmul.mubr.f32.gmra.mxu1 %v681_v16  ;;  %v3633_v10 = vpop.f32.mrf.mxu1 }
  0xe5   :  { %v682_v28 = vmax.f32 %v420_v25, 0.0  ;;  %v435_v29 = vadd.f32 %v2615_v27, %v3529_v17 }
  0xe6   :  { %v429_v30 = vpop.f32.mrf.mxu0  ;;  %v3637_v19 = vpop.f32.mrf.mxu1 }
  0xe7   :  { %v430_v32 = vadd.f32 %v3529_v17, %v429_v30  ;;  %2738 = vmatprep.mubr.f32.mxu1 %v682_v28  ;;  %v685_v33 = vmax.f32 %v435_v29, 0.0 }
  0xe8   :  { %v2618_v34 = vpop.f32.mrf.mxu0  ;;  %2739 = vmatmul.mubr.f32.gmra.mxu1 %v683_v26  ;;  %v510_v26 = vadd.f32 %v3529_v17, %v3554_v42  ;;  %v589_v28 = vpop.f32.mrf.mxu1  ;;  %v525_v42 = vadd.f32 %v3560_v47, %v3529_v17  ;;  %v545_v47 = vadd.f32 %v3584_v3, %v3529_v17  ;;  %v560_v3 = vadd.f32 %v3529_v17, %v3617_v39 }
  0xe9   :  { %v684_v35 = vmax.f32 %v430_v32, 0.0  ;;  %v445_v36 = vadd.f32 %v2618_v34, %v3529_v17  ;;  %v515_v32 = vadd.f32 %v3548_v37, %v3529_v17  ;;  %v580_v39 = vadd.f32 %v3529_v17, %v3633_v10 }
  0xea   :  { %v439_v38 = vpop.f32.mrf.mxu0  ;;  %v700_v34 = vmax.f32 %v510_v26, 0.0  ;;  %v703_v37 = vmax.f32 %v525_v42, 0.0 }
  0xeb   :  { %v440_v40 = vadd.f32 %v3529_v17, %v439_v38  ;;  %2741 = vmatprep.mubr.f32.mxu1 %v684_v35  ;;  %v687_v41 = vmax.f32 %v445_v36, 0.0  ;;  %v520_v35 = vadd.f32 %v3529_v17, %v3566_v52  ;;  %v2666_v36 = vpop.f32.mrf.mxu1  ;;  %v701_v38 = vmax.f32 %v515_v32, 0.0 }
  0xec   :  { %v2621_v43 = vpop.f32.mrf.mxu0  ;;  %2742 = vmatmul.mubr.f32.gmra.mxu1 %v685_v33  ;;  %v540_v52 = vadd.f32 %v3529_v17, %v3590_v8  ;;  %v555_v8 = vadd.f32 %v3596_v13, %v3529_v17  ;;  %v575_v13 = vadd.f32 %v3621_v48, %v3529_v17  ;;  %v595_v48 = vadd.f32 %v3637_v19, %v3529_v17 }
  0xed   :  { %v686_v44 = vmax.f32 %v440_v40, 0.0  ;;  %v455_v45 = vadd.f32 %v2621_v43, %v3529_v17  ;;  %v702_v40 = vmax.f32 %v520_v35, 0.0  ;;  %v599_v43 = vpop.f32.mrf.mxu1 }
  0xee   :  { %v449_v46 = vpop.f32.mrf.mxu0  ;;  %v600_v10 = vadd.f32 %v3529_v17, %v599_v43 }
  0xef   :  { %v450_v49 = vadd.f32 %v3529_v17, %v449_v46  ;;  %2744 = vmatprep.mubr.f32.mxu1 %v686_v44  ;;  %v689_v50 = vmax.f32 %v455_v45, 0.0  ;;  %v535_v44 = vadd.f32 %v3572_v57, %v3529_v17  ;;  %v2669_v46 = vpop.f32.mrf.mxu1  ;;  %v2344_v57 = vld [vmem:[%s4536_s1 + $0x100] sm:$0xff] }
  0xf0   :  { %v2624_v51 = vpop.f32.mrf.mxu0  ;;  %2745 = vmatmul.mubr.f32.gmra.mxu1 %v687_v41  ;;  %v530_v41 = vadd.f32 %v3529_v17, %v3578_v62  ;;  %v550_v62 = vadd.f32 %v3529_v17, %v3606_v23  ;;  %2843 = vmatprep.subr.mxu0 %v2344_v57  ;;  %v565_v23 = vadd.f32 %v3613_v31, %v3529_v17 }
  0xf1   :  { %v688_v53 = vmax.f32 %v450_v49, 0.0  ;;  %v465_v54 = vadd.f32 %v2624_v51, %v3529_v17  ;;  %v705_v49 = vmax.f32 %v535_v44, 0.0  ;;  %v609_v51 = vpop.f32.mrf.mxu1  ;;  %2844 = vmatpush3.msra.mxu0 %v2344_v57  ;;  %v585_v31 = vadd.f32 %v3629_v1, %v3529_v17 }
  0xf2   :  { %v459_v55 = vpop.f32.mrf.mxu0  ;;  %v704_v45 = vmax.f32 %v530_v41, 0.0  ;;  %v718_v1 = vmax.f32 %v600_v10, 0.0 }
  0xf3   :  { %v460_v58 = vadd.f32 %v3529_v17, %v459_v55  ;;  %2747 = vmatprep.mubr.f32.mxu1 %v688_v53  ;;  %v691_v59 = vmax.f32 %v465_v54, 0.0  ;;  %v707_v53 = vmax.f32 %v545_v47, 0.0  ;;  %v708_v54 = vmax.f32 %v550_v62, 0.0  ;;  %v2672_v55 = vpop.f32.mrf.mxu1  ;;  %v3697_v47 = vld [vmem:[%s4538_s2 + $0x1] ss:$0 sm:$0xff] }
  0xf4   :  { %v2627_v60 = vpop.f32.mrf.mxu0  ;;  %2748 = vmatmul.mubr.f32.gmra.mxu1 %v689_v50  ;;  %v706_v50 = vmax.f32 %v540_v52, 0.0 }
  0xf5   :  { %v690_v61 = vmax.f32 %v460_v58, 0.0  ;;  %v475_v63 = vadd.f32 %v2627_v60, %v3529_v17  ;;  %v709_v58 = vmax.f32 %v555_v8, 0.0  ;;  %v570_v60 = vadd.f32 %v3529_v17, %v3625_v56 }
  0xf6   :  { %v469_v0 = vpop.f32.mrf.mxu0  ;;  %v590_v56 = vadd.f32 %v3529_v17, %v589_v28 }
  0xf7   :  { %v470_v2 = vadd.f32 %v3529_v17, %v469_v0  ;;  %2750 = vmatprep.mubr.f32.mxu1 %v690_v61  ;;  %v693_v4 = vmax.f32 %v475_v63, 0.0  ;;  %v619_v61 = vpop.f32.mrf.mxu1  ;;  %v711_v63 = vmax.f32 %v565_v23, 0.0  ;;  %v712_v0 = vmax.f32 %v570_v60, 0.0 }
  0xf8   :  { %v2630_v5 = vpop.f32.mrf.mxu0  ;;  %2751 = vmatmul.mubr.f32.gmra.mxu1 %v691_v59  ;;  %v710_v59 = vmax.f32 %v560_v3, 0.0 }
  0xf9   :  { %v692_v6 = vmax.f32 %v470_v2, 0.0  ;;  %v485_v7 = vadd.f32 %v2630_v5, %v3529_v17  ;;  %v2675_v2 = vpop.f32.mrf.mxu1  ;;  %v714_v5 = vmax.f32 %v580_v39, 0.0 }
  0xfa   :  { %v479_v9 = vpop.f32.mrf.mxu0 }
  0xfb   :  { %v480_v11 = vadd.f32 %v3529_v17, %v479_v9  ;;  %2753 = vmatprep.mubr.f32.mxu1 %v692_v6  ;;  %v695_v12 = vmax.f32 %v485_v7, 0.0  ;;  %v629_v6 = vpop.f32.mrf.mxu1  ;;  %v715_v7 = vmax.f32 %v585_v31, 0.0  ;;  %v716_v9 = vmax.f32 %v590_v56, 0.0 }
  0xfc   :  { %v2633_v14 = vpop.f32.mrf.mxu0  ;;  %2754 = vmatmul.mubr.f32.gmra.mxu1 %v693_v4  ;;  %v713_v4 = vmax.f32 %v575_v13, 0.0 }
  0xfd   :  { %v694_v15 = vmax.f32 %v480_v11, 0.0  ;;  %v495_v16 = vadd.f32 %v2633_v14, %v3529_v17  ;;  %v2678_v11 = vpop.f32.mrf.mxu1  ;;  %v605_v14 = vadd.f32 %v2666_v36, %v3529_v17 }
  0xfe   :  { %v489_v18 = vpop.f32.mrf.mxu0  ;;  %v645_v36 = vadd.f32 %v2678_v11, %v3529_v17 }
  0xff   :  { %v490_v20 = vadd.f32 %v3529_v17, %v489_v18  ;;  %2756 = vmatprep.mubr.f32.mxu1 %v694_v15  ;;  %v697_v21 = vmax.f32 %v495_v16, 0.0  ;;  %v610_v15 = vadd.f32 %v3529_v17, %v609_v51  ;;  %v639_v16 = vpop.f32.mrf.mxu1  ;;  %v719_v18 = vmax.f32 %v605_v14, 0.0 }
 0x100   :  { %v2636_v22 = vpop.f32.mrf.mxu0  ;;  %2757 = vmatmul.mubr.f32.gmra.mxu1 %v695_v12  ;;  %v717_v12 = vmax.f32 %v595_v48, 0.0  ;;  %v727_v41 = vmax.f32 %v645_v36, 0.0 }
 0x101   :  { %v696_v24 = vmax.f32 %v490_v20, 0.0  ;;  %v505_v25 = vadd.f32 %v2636_v22, %v3529_v17  ;;  %v615_v20 = vadd.f32 %v2669_v46, %v3529_v17  ;;  %v720_v19 = vmax.f32 %v610_v15, 0.0  ;;  %v2681_v22 = vpop.f32.mrf.mxu1 }
 0x102   :  { %v499_v27 = vpop.f32.mrf.mxu0  ;;  %v655_v43 = vadd.f32 %v2681_v22, %v3529_v17 }
 0x103   :  { %v500_v29 = vadd.f32 %v3529_v17, %v499_v27  ;;  %2759 = vmatprep.mubr.f32.mxu1 %v696_v24  ;;  %v699_v30 = vmax.f32 %v505_v25, 0.0  ;;  %v721_v24 = vmax.f32 %v615_v20, 0.0  ;;  %v625_v25 = vadd.f32 %v2672_v55, %v3529_v17  ;;  %v649_v28 = vpop.f32.mrf.mxu1 }
 0x104   :  { %2760 = vmatmul.mubr.f32.gmra.mxu1 %v697_v21  ;;  %v620_v21 = vadd.f32 %v3529_v17, %v619_v61  ;;  %v630_v27 = vadd.f32 %v3529_v17, %v629_v6  ;;  %v650_v42 = vadd.f32 %v3529_v17, %v649_v28 }
 0x105   :  { %v698_v33 = vmax.f32 %v500_v29, 0.0  ;;  %v723_v29 = vmax.f32 %v625_v25, 0.0 }
 0x106   :  { %v722_v26 = vmax.f32 %v620_v21, 0.0  ;;  %v724_v32 = vmax.f32 %v630_v27, 0.0 }
 0x107   :  { %2762 = vmatprep.mubr.f32.mxu1 %v698_v33  ;;  %v640_v33 = vadd.f32 %v3529_v17, %v639_v16 }
 0x108   :  { %2763 = vmatmul.mubr.f32.gmra.mxu1 %v699_v30  ;;  %v635_v30 = vadd.f32 %v2675_v2, %v3529_v17 }
 0x109   :  { %2765 = vmatprep.mubr.f32.mxu1 %v700_v34  ;;  %v2684_v34 = vpop.f32.mrf.mxu1 }
 0x10a   :  { %v725_v35 = vmax.f32 %v635_v30, 0.0  ;;  %v665_v52 = vadd.f32 %v2684_v34, %v3529_v17 }
 0x10c   :  { %2766 = vmatmul.mubr.f32.gmra.mxu1 %v701_v38  ;;  %v726_v38 = vmax.f32 %v640_v33, 0.0 }
 0x10d   :  { %2768 = vmatprep.mubr.f32.mxu1 %v702_v40  ;;  %v659_v40 = vpop.f32.mrf.mxu1 }
 0x10e   :  { %v660_v44 = vadd.f32 %v3529_v17, %v659_v40 }
 0x110   :  { %2769 = vmatmul.mubr.f32.gmra.mxu1 %v703_v37  ;;  %v728_v37 = vmax.f32 %v650_v42, 0.0  ;;  %v730_v46 = vmax.f32 %v660_v44, 0.0 }
 0x111   :  { %2771 = vmatprep.mubr.f32.mxu1 %v704_v45  ;;  %v729_v45 = vmax.f32 %v655_v43, 0.0 }
 0x114   :  { %2772 = vmatmul.mubr.f32.gmra.mxu1 %v705_v49  ;;  %v731_v49 = vmax.f32 %v665_v52, 0.0 }
 0x115   :  { %2774 = vmatprep.mubr.f32.mxu1 %v706_v50 }
 0x118   :  { %2775 = vmatmul.mubr.f32.gmra.mxu1 %v707_v53 }
 0x119   :  { %2777 = vmatprep.mubr.f32.mxu1 %v708_v54 }
 0x11c   :  { %2778 = vmatmul.mubr.f32.gmra.mxu1 %v709_v58 }
 0x11d   :  { %2780 = vmatprep.mubr.f32.mxu1 %v710_v59 }
 0x120   :  { %2781 = vmatmul.mubr.f32.gmra.mxu1 %v711_v63 }
 0x121   :  { %2783 = vmatprep.mubr.f32.mxu1 %v712_v0 }
 0x124   :  { %2784 = vmatmul.mubr.f32.gmra.mxu1 %v713_v4 }
 0x125   :  { %2786 = vmatprep.mubr.f32.mxu1 %v714_v5 }
 0x128   :  { %2787 = vmatmul.mubr.f32.gmra.mxu1 %v715_v7 }
 0x129   :  { %2789 = vmatprep.mubr.f32.mxu1 %v716_v9 }
 0x12c   :  { %2790 = vmatmul.mubr.f32.gmra.mxu1 %v717_v12 }
 0x12d   :  { %2792 = vmatprep.mubr.f32.mxu1 %v718_v1 }
 0x130   :  { %2793 = vmatmul.mubr.f32.gmra.mxu1 %v719_v18 }
 0x131   :  { %2795 = vmatprep.mubr.f32.mxu1 %v720_v19 }
 0x134   :  { %2796 = vmatmul.mubr.f32.gmra.mxu1 %v721_v24 }
 0x135   :  { %2798 = vmatprep.mubr.f32.mxu1 %v722_v26 }
 0x138   :  { %2799 = vmatmul.mubr.f32.gmra.mxu1 %v723_v29 }
 0x139   :  { %2801 = vmatprep.mubr.f32.mxu1 %v724_v32 }
 0x13c   :  { %2802 = vmatmul.mubr.f32.gmra.mxu1 %v725_v35 }
 0x13d   :  { %2804 = vmatprep.mubr.f32.mxu1 %v726_v38 }
 0x140   :  { %2805 = vmatmul.mubr.f32.gmra.mxu1 %v727_v41 }
 0x141   :  { %2807 = vmatprep.mubr.f32.mxu1 %v728_v37 }
 0x144   :  { %2808 = vmatmul.mubr.f32.gmra.mxu1 %v729_v45 }
 0x145   :  { %2810 = vmatprep.mubr.f32.mxu1 %v730_v46 }
 0x148   :  { %2811 = vmatmul.mubr.f32.gmra.mxu1 %v731_v49 }
 0x18c   :  { %v2719_v50 = vpop.f32.mrf.mxu1 }
 0x18d   :  { %v829_v62 = vadd.f32 %v2719_v50, %v3697_v47 }
 0x18e   :  { %v823_v57 = vpop.f32.mrf.mxu1 }
 0x18f   :  { %v824_v51 = vadd.f32 %v3697_v47, %v823_v57  ;;  %v1143_v8 = vmax.f32 %v829_v62, 0.0 }
 0x190   :  { %v2722_v53 = vpop.f32.mrf.mxu1 }
 0x191   :  { %v1142_v17 = vmax.f32 %v824_v51, 0.0  ;;  %v839_v54 = vadd.f32 %v2722_v53, %v3697_v47 }
 0x192   :  { %v833_v3 = vpop.f32.mrf.mxu1 }
 0x193   :  { %v834_v55 = vadd.f32 %v3697_v47, %v833_v3  ;;  %2845 = vmatprep.mubr.f32.mxu0 %v1142_v17  ;;  %v1145_v59 = vmax.f32 %v839_v54, 0.0 }
 0x194   :  { %v2725_v58 = vpop.f32.mrf.mxu1  ;;  %2846 = vmatmul.mubr.f32.vlgmr.msra.gmra.mxu0 %v1143_v8 }
 0x195   :  { %v1144_v23 = vmax.f32 %v834_v55, 0.0  ;;  %v849_v60 = vadd.f32 %v2725_v58, %v3697_v47 }
 0x196   :  { %v843_v61 = vpop.f32.mrf.mxu1 }
 0x197   :  { %v844_v63 = vadd.f32 %v3697_v47, %v843_v61  ;;  %2848 = vmatprep.mubr.f32.mxu0 %v1144_v23  ;;  %v1147_v39 = vmax.f32 %v849_v60, 0.0 }
 0x198   :  { %v2728_v13 = vpop.f32.mrf.mxu1  ;;  %2849 = vmatmul.mubr.f32.gmra.mxu0 %v1145_v59 }
 0x199   :  { %v1146_v0 = vmax.f32 %v844_v63, 0.0  ;;  %v859_v2 = vadd.f32 %v2728_v13, %v3697_v47 }
 0x19a   :  { %v853_v4 = vpop.f32.mrf.mxu1 }
 0x19b   :  { %v854_v31 = vadd.f32 %v3697_v47, %v853_v4  ;;  %2851 = vmatprep.mubr.f32.mxu0 %v1146_v0  ;;  %v1149_v6 = vmax.f32 %v859_v2, 0.0 }
 0x19c   :  { %v2731_v5 = vpop.f32.mrf.mxu1  ;;  %2852 = vmatmul.mubr.f32.gmra.mxu0 %v1147_v39 }
 0x19d   :  { %v1148_v56 = vmax.f32 %v854_v31, 0.0  ;;  %v869_v7 = vadd.f32 %v2731_v5, %v3697_v47 }
 0x19e   :  { %v863_v48 = vpop.f32.mrf.mxu1 }
 0x19f   :  { %v864_v9 = vadd.f32 %v3697_v47, %v863_v48  ;;  %2854 = vmatprep.mubr.f32.mxu0 %v1148_v56  ;;  %v1151_v12 = vmax.f32 %v869_v7, 0.0 }
 0x1a0   :  { %v2734_v10 = vpop.f32.mrf.mxu1  ;;  %2855 = vmatmul.mubr.f32.gmra.mxu0 %v1149_v6 }
 0x1a1   :  { %v1150_v11 = vmax.f32 %v864_v9, 0.0  ;;  %v879_v14 = vadd.f32 %v2734_v10, %v3697_v47 }
 0x1a2   :  { %v873_v1 = vpop.f32.mrf.mxu1 }
 0x1a3   :  { %v874_v15 = vadd.f32 %v3697_v47, %v873_v1  ;;  %2857 = vmatprep.mubr.f32.mxu0 %v1150_v11  ;;  %v1153_v20 = vmax.f32 %v879_v14, 0.0 }
 0x1a4   :  { %v2737_v16 = vpop.f32.mrf.mxu1  ;;  %2858 = vmatmul.mubr.f32.gmra.mxu0 %v1151_v12 }
 0x1a5   :  { %v1152_v18 = vmax.f32 %v874_v15, 0.0  ;;  %v889_v19 = vadd.f32 %v2737_v16, %v3697_v47 }
 0x1a6   :  { %v883_v21 = vpop.f32.mrf.mxu1 }
 0x1a7   :  { %v884_v22 = vadd.f32 %v3697_v47, %v883_v21  ;;  %2860 = vmatprep.mubr.f32.mxu0 %v1152_v18  ;;  %v1155_v26 = vmax.f32 %v889_v19, 0.0 }
 0x1a8   :  { %v2740_v24 = vpop.f32.mrf.mxu1  ;;  %2861 = vmatmul.mubr.f32.gmra.mxu0 %v1153_v20 }
 0x1a9   :  { %v1154_v25 = vmax.f32 %v884_v22, 0.0  ;;  %v899_v27 = vadd.f32 %v2740_v24, %v3697_v47 }
 0x1aa   :  { %v893_v28 = vpop.f32.mrf.mxu1 }
 0x1ab   :  { %v894_v29 = vadd.f32 %v3697_v47, %v893_v28  ;;  %2863 = vmatprep.mubr.f32.mxu0 %v1154_v25  ;;  %v1157_v33 = vmax.f32 %v899_v27, 0.0 }
 0x1ac   :  { %v2743_v30 = vpop.f32.mrf.mxu1  ;;  %2864 = vmatmul.mubr.f32.gmra.mxu0 %v1155_v26 }
 0x1ad   :  { %v1156_v32 = vmax.f32 %v894_v29, 0.0  ;;  %v909_v34 = vadd.f32 %v2743_v30, %v3697_v47 }
 0x1ae   :  { %v903_v35 = vpop.f32.mrf.mxu1 }
 0x1af   :  { %v904_v36 = vadd.f32 %v3697_v47, %v903_v35  ;;  %2866 = vmatprep.mubr.f32.mxu0 %v1156_v32  ;;  %v1159_v40 = vmax.f32 %v909_v34, 0.0 }
 0x1b0   :  { %v2746_v38 = vpop.f32.mrf.mxu1  ;;  %2867 = vmatmul.mubr.f32.gmra.mxu0 %v1157_v33 }
 0x1b1   :  { %v1158_v42 = vmax.f32 %v904_v36, 0.0  ;;  %v919_v41 = vadd.f32 %v2746_v38, %v3697_v47 }
 0x1b2   :  { %v913_v43 = vpop.f32.mrf.mxu1 }
 0x1b3   :  { %v914_v37 = vadd.f32 %v3697_v47, %v913_v43  ;;  %2869 = vmatprep.mubr.f32.mxu0 %v1158_v42  ;;  %v1161_v52 = vmax.f32 %v919_v41, 0.0 }
 0x1b4   :  { %v2749_v44 = vpop.f32.mrf.mxu1  ;;  %2870 = vmatmul.mubr.f32.gmra.mxu0 %v1159_v40 }
 0x1b5   :  { %v1160_v45 = vmax.f32 %v914_v37, 0.0  ;;  %v929_v46 = vadd.f32 %v2749_v44, %v3697_v47 }
 0x1b6   :  { %v923_v49 = vpop.f32.mrf.mxu1 }
 0x1b7   :  { %v924_v50 = vadd.f32 %v3697_v47, %v923_v49  ;;  %2872 = vmatprep.mubr.f32.mxu0 %v1160_v45  ;;  %v1163_v51 = vmax.f32 %v929_v46, 0.0 }
 0x1b8   :  { %v2752_v62 = vpop.f32.mrf.mxu1  ;;  %2873 = vmatmul.mubr.f32.gmra.mxu0 %v1161_v52 }
 0x1b9   :  { %v1162_v57 = vmax.f32 %v924_v50, 0.0  ;;  %v939_v53 = vadd.f32 %v2752_v62, %v3697_v47 }
 0x1ba   :  { %v933_v17 = vpop.f32.mrf.mxu1 }
 0x1bb   :  { %v934_v8 = vadd.f32 %v3697_v47, %v933_v17  ;;  %2875 = vmatprep.mubr.f32.mxu0 %v1162_v57  ;;  %v1165_v55 = vmax.f32 %v939_v53, 0.0 }
 0x1bc   :  { %v2755_v54 = vpop.f32.mrf.mxu1  ;;  %2876 = vmatmul.mubr.f32.gmra.mxu0 %v1163_v51 }
 0x1bd   :  { %v1164_v3 = vmax.f32 %v934_v8, 0.0  ;;  %v949_v58 = vadd.f32 %v2755_v54, %v3697_v47 }
 0x1be   :  { %v943_v23 = vpop.f32.mrf.mxu1 }
 0x1bf   :  { %v944_v59 = vadd.f32 %v3697_v47, %v943_v23  ;;  %2878 = vmatprep.mubr.f32.mxu0 %v1164_v3  ;;  %v1167_v63 = vmax.f32 %v949_v58, 0.0 }
 0x1c0   :  { %v2758_v60 = vpop.f32.mrf.mxu1  ;;  %2879 = vmatmul.mubr.f32.gmra.mxu0 %v1165_v55 }
 0x1c1   :  { %v1166_v61 = vmax.f32 %v944_v59, 0.0  ;;  %v959_v13 = vadd.f32 %v2758_v60, %v3697_v47 }
 0x1c2   :  { %v953_v0 = vpop.f32.mrf.mxu1 }
 0x1c3   :  { %v954_v39 = vadd.f32 %v3697_v47, %v953_v0  ;;  %2881 = vmatprep.mubr.f32.mxu0 %v1166_v61  ;;  %v1169_v31 = vmax.f32 %v959_v13, 0.0 }
 0x1c4   :  { %v2761_v2 = vpop.f32.mrf.mxu1  ;;  %2882 = vmatmul.mubr.f32.gmra.mxu0 %v1167_v63 }
 0x1c5   :  { %v1168_v4 = vmax.f32 %v954_v39, 0.0  ;;  %v969_v5 = vadd.f32 %v2761_v2, %v3697_v47 }
 0x1c6   :  { %v963_v56 = vpop.f32.mrf.mxu1 }
 0x1c7   :  { %v964_v6 = vadd.f32 %v3697_v47, %v963_v56  ;;  %2884 = vmatprep.mubr.f32.mxu0 %v1168_v4  ;;  %v1171_v9 = vmax.f32 %v969_v5, 0.0 }
 0x1c8   :  { %v2764_v7 = vpop.f32.mrf.mxu1  ;;  %2885 = vmatmul.mubr.f32.gmra.mxu0 %v1169_v31 }
 0x1c9   :  { %v1170_v48 = vmax.f32 %v964_v6, 0.0  ;;  %v979_v10 = vadd.f32 %v2764_v7, %v3697_v47 }
 0x1ca   :  { %v973_v11 = vpop.f32.mrf.mxu1 }
 0x1cb   :  { %v974_v12 = vadd.f32 %v3697_v47, %v973_v11  ;;  %2887 = vmatprep.mubr.f32.mxu0 %v1170_v48  ;;  %v1173_v15 = vmax.f32 %v979_v10, 0.0 }
 0x1cc   :  { %v2767_v14 = vpop.f32.mrf.mxu1  ;;  %2888 = vmatmul.mubr.f32.gmra.mxu0 %v1171_v9 }
 0x1cd   :  { %v1172_v1 = vmax.f32 %v974_v12, 0.0  ;;  %v989_v16 = vadd.f32 %v2767_v14, %v3697_v47 }
 0x1ce   :  { %v983_v18 = vpop.f32.mrf.mxu1 }
 0x1cf   :  { %v984_v20 = vadd.f32 %v3697_v47, %v983_v18  ;;  %2890 = vmatprep.mubr.f32.mxu0 %v1172_v1  ;;  %v1175_v22 = vmax.f32 %v989_v16, 0.0 }
 0x1d0   :  { %v2770_v19 = vpop.f32.mrf.mxu1  ;;  %2891 = vmatmul.mubr.f32.gmra.mxu0 %v1173_v15 }
 0x1d1   :  { %v1174_v21 = vmax.f32 %v984_v20, 0.0  ;;  %v999_v24 = vadd.f32 %v2770_v19, %v3697_v47 }
 0x1d2   :  { %v993_v25 = vpop.f32.mrf.mxu1 }
 0x1d3   :  { %v994_v26 = vadd.f32 %v3697_v47, %v993_v25  ;;  %2893 = vmatprep.mubr.f32.mxu0 %v1174_v21  ;;  %v1177_v29 = vmax.f32 %v999_v24, 0.0 }
 0x1d4   :  { %v2773_v27 = vpop.f32.mrf.mxu1  ;;  %2894 = vmatmul.mubr.f32.gmra.mxu0 %v1175_v22 }
 0x1d5   :  { %v1176_v28 = vmax.f32 %v994_v26, 0.0  ;;  %v1009_v30 = vadd.f32 %v2773_v27, %v3697_v47 }
 0x1d6   :  { %v1003_v32 = vpop.f32.mrf.mxu1 }
 0x1d7   :  { %v1004_v33 = vadd.f32 %v3697_v47, %v1003_v32  ;;  %2896 = vmatprep.mubr.f32.mxu0 %v1176_v28  ;;  %v1179_v36 = vmax.f32 %v1009_v30, 0.0 }
 0x1d8   :  { %v2776_v34 = vpop.f32.mrf.mxu1  ;;  %2897 = vmatmul.mubr.f32.gmra.mxu0 %v1177_v29 }
 0x1d9   :  { %v1178_v35 = vmax.f32 %v1004_v33, 0.0  ;;  %v1019_v38 = vadd.f32 %v2776_v34, %v3697_v47 }
 0x1da   :  { %v1013_v42 = vpop.f32.mrf.mxu1 }
 0x1db   :  { %v1014_v40 = vadd.f32 %v3697_v47, %v1013_v42  ;;  %2899 = vmatprep.mubr.f32.mxu0 %v1178_v35  ;;  %v1181_v37 = vmax.f32 %v1019_v38, 0.0 }
 0x1dc   :  { %v2779_v41 = vpop.f32.mrf.mxu1  ;;  %2900 = vmatmul.mubr.f32.gmra.mxu0 %v1179_v36 }
 0x1dd   :  { %v1180_v43 = vmax.f32 %v1014_v40, 0.0  ;;  %v1029_v44 = vadd.f32 %v2779_v41, %v3697_v47 }
 0x1de   :  { %v1023_v45 = vpop.f32.mrf.mxu1 }
 0x1df   :  { %v1024_v52 = vadd.f32 %v3697_v47, %v1023_v45  ;;  %2902 = vmatprep.mubr.f32.mxu0 %v1180_v43  ;;  %v1183_v50 = vmax.f32 %v1029_v44, 0.0 }
 0x1e0   :  { %v2782_v46 = vpop.f32.mrf.mxu1  ;;  %2903 = vmatmul.mubr.f32.gmra.mxu0 %v1181_v37 }
 0x1e1   :  { %v1182_v49 = vmax.f32 %v1024_v52, 0.0  ;;  %v1039_v62 = vadd.f32 %v2782_v46, %v3697_v47 }
 0x1e2   :  { %v1033_v57 = vpop.f32.mrf.mxu1 }
 0x1e3   :  { %v1034_v51 = vadd.f32 %v3697_v47, %v1033_v57  ;;  %2905 = vmatprep.mubr.f32.mxu0 %v1182_v49  ;;  %v1185_v8 = vmax.f32 %v1039_v62, 0.0 }
 0x1e4   :  { %v2785_v53 = vpop.f32.mrf.mxu1  ;;  %2906 = vmatmul.mubr.f32.gmra.mxu0 %v1183_v50 }
 0x1e5   :  { %v1184_v17 = vmax.f32 %v1034_v51, 0.0  ;;  %v1049_v54 = vadd.f32 %v2785_v53, %v3697_v47  ;;  %v3766_v51 = vld [vmem:[%s4538_s2 + $0x2] ss:$0 sm:$0xff] }
 0x1e6   :  { %v1043_v3 = vpop.f32.mrf.mxu1 }
 0x1e7   :  { %v1044_v55 = vadd.f32 %v3697_v47, %v1043_v3  ;;  %2908 = vmatprep.mubr.f32.mxu0 %v1184_v17  ;;  %v1187_v59 = vmax.f32 %v1049_v54, 0.0 }
 0x1e8   :  { %v2788_v58 = vpop.f32.mrf.mxu1  ;;  %2909 = vmatmul.mubr.f32.gmra.mxu0 %v1185_v8 }
 0x1e9   :  { %v1186_v23 = vmax.f32 %v1044_v55, 0.0  ;;  %v1059_v60 = vadd.f32 %v2788_v58, %v3697_v47 }
 0x1ea   :  { %v1053_v61 = vpop.f32.mrf.mxu1 }
 0x1eb   :  { %v1054_v63 = vadd.f32 %v3697_v47, %v1053_v61  ;;  %2911 = vmatprep.mubr.f32.mxu0 %v1186_v23  ;;  %v1189_v39 = vmax.f32 %v1059_v60, 0.0 }
 0x1ec   :  { %v2791_v13 = vpop.f32.mrf.mxu1  ;;  %2912 = vmatmul.mubr.f32.gmra.mxu0 %v1187_v59 }
 0x1ed   :  { %v1188_v0 = vmax.f32 %v1054_v63, 0.0  ;;  %v1069_v2 = vadd.f32 %v2791_v13, %v3697_v47 }
 0x1ee   :  { %v1063_v4 = vpop.f32.mrf.mxu1 }
 0x1ef   :  { %v1064_v31 = vadd.f32 %v3697_v47, %v1063_v4  ;;  %2914 = vmatprep.mubr.f32.mxu0 %v1188_v0  ;;  %v1191_v6 = vmax.f32 %v1069_v2, 0.0 }
 0x1f0   :  { %v2794_v5 = vpop.f32.mrf.mxu1  ;;  %2915 = vmatmul.mubr.f32.gmra.mxu0 %v1189_v39 }
 0x1f1   :  { %v1190_v56 = vmax.f32 %v1064_v31, 0.0  ;;  %v1079_v7 = vadd.f32 %v2794_v5, %v3697_v47 }
 0x1f2   :  { %v1073_v48 = vpop.f32.mrf.mxu1 }
 0x1f3   :  { %v1074_v9 = vadd.f32 %v3697_v47, %v1073_v48  ;;  %2917 = vmatprep.mubr.f32.mxu0 %v1190_v56  ;;  %v1193_v12 = vmax.f32 %v1079_v7, 0.0 }
 0x1f4   :  { %v2797_v10 = vpop.f32.mrf.mxu1  ;;  %2918 = vmatmul.mubr.f32.gmra.mxu0 %v1191_v6 }
 0x1f5   :  { %v1192_v11 = vmax.f32 %v1074_v9, 0.0  ;;  %v1089_v14 = vadd.f32 %v2797_v10, %v3697_v47 }
 0x1f6   :  { %v1083_v1 = vpop.f32.mrf.mxu1 }
 0x1f7   :  { %v1084_v15 = vadd.f32 %v3697_v47, %v1083_v1  ;;  %2920 = vmatprep.mubr.f32.mxu0 %v1192_v11  ;;  %v1195_v20 = vmax.f32 %v1089_v14, 0.0 }
 0x1f8   :  { %v2800_v16 = vpop.f32.mrf.mxu1  ;;  %2921 = vmatmul.mubr.f32.gmra.mxu0 %v1193_v12 }
 0x1f9   :  { %v1194_v18 = vmax.f32 %v1084_v15, 0.0  ;;  %v1099_v19 = vadd.f32 %v2800_v16, %v3697_v47 }
 0x1fa   :  { %v1093_v21 = vpop.f32.mrf.mxu1 }
 0x1fb   :  { %v1094_v22 = vadd.f32 %v3697_v47, %v1093_v21  ;;  %2923 = vmatprep.mubr.f32.mxu0 %v1194_v18  ;;  %v1197_v26 = vmax.f32 %v1099_v19, 0.0 }
 0x1fc   :  { %v2803_v24 = vpop.f32.mrf.mxu1  ;;  %2924 = vmatmul.mubr.f32.gmra.mxu0 %v1195_v20 }
 0x1fd   :  { %v1196_v25 = vmax.f32 %v1094_v22, 0.0  ;;  %v1109_v27 = vadd.f32 %v2803_v24, %v3697_v47 }
 0x1fe   :  { %v1103_v28 = vpop.f32.mrf.mxu1 }
 0x1ff   :  { %v1104_v29 = vadd.f32 %v3697_v47, %v1103_v28  ;;  %2926 = vmatprep.mubr.f32.mxu0 %v1196_v25  ;;  %v1199_v33 = vmax.f32 %v1109_v27, 0.0 }
 0x200   :  { %v2806_v30 = vpop.f32.mrf.mxu1  ;;  %2927 = vmatmul.mubr.f32.gmra.mxu0 %v1197_v26 }
 0x201   :  { %v1198_v32 = vmax.f32 %v1104_v29, 0.0  ;;  %v1119_v34 = vadd.f32 %v2806_v30, %v3697_v47 }
 0x202   :  { %v1113_v35 = vpop.f32.mrf.mxu1 }
 0x203   :  { %v1114_v36 = vadd.f32 %v3697_v47, %v1113_v35  ;;  %2929 = vmatprep.mubr.f32.mxu0 %v1198_v32  ;;  %v1201_v40 = vmax.f32 %v1119_v34, 0.0 }
 0x204   :  { %v2809_v38 = vpop.f32.mrf.mxu1  ;;  %2930 = vmatmul.mubr.f32.gmra.mxu0 %v1199_v33 }
 0x205   :  { %v1200_v42 = vmax.f32 %v1114_v36, 0.0  ;;  %v1129_v41 = vadd.f32 %v2809_v38, %v3697_v47 }
 0x206   :  { %v1123_v43 = vpop.f32.mrf.mxu1 }
 0x207   :  { %v1124_v37 = vadd.f32 %v3697_v47, %v1123_v43  ;;  %2932 = vmatprep.mubr.f32.mxu0 %v1200_v42  ;;  %v1203_v52 = vmax.f32 %v1129_v41, 0.0 }
 0x208   :  { %v2812_v44 = vpop.f32.mrf.mxu1  ;;  %2933 = vmatmul.mubr.f32.gmra.mxu0 %v1201_v40 }
 0x209   :  { %v1202_v45 = vmax.f32 %v1124_v37, 0.0  ;;  %v1139_v46 = vadd.f32 %v2812_v44, %v3697_v47 }
 0x20a   :  { %v1133_v49 = vpop.f32.mrf.mxu1 }
 0x20b   :  { %v1134_v50 = vadd.f32 %v3697_v47, %v1133_v49  ;;  %2935 = vmatprep.mubr.f32.mxu0 %v1202_v45  ;;  %v1205_v57 = vmax.f32 %v1139_v46, 0.0 }
 0x20c   :  { %2936 = vmatmul.mubr.f32.gmra.mxu0 %v1203_v52 }
 0x20d   :  { %v1204_v62 = vmax.f32 %v1134_v50, 0.0 }
 0x20f   :  { %2938 = vmatprep.mubr.f32.mxu0 %v1204_v62 }
 0x210   :  { %2939 = vmatmul.mubr.f32.gmra.mxu0 %v1205_v57 }
 0x254   :  { %v2847_v53 = vpop.f32.mrf.mxu0 }
 0x255   :  { %v3769_v17 = vadd.f32 %v2847_v53, %v3766_v51 }
 0x256   :  { %v1297_v8 = vpop.f32.mrf.mxu0 }
 0x257   :  { %1618 = vmax.xlane.f32.xlu0 %v3769_v17  ;;  %v3773_v47 = vadd.f32 %v3766_v51, %v1297_v8 }
 0x258   :  { %v2850_v54 = vpop.f32.mrf.mxu0 }
 0x259   :  { %v3776_v3 = vadd.f32 %v2850_v54, %v3766_v51 }
 0x25a   :  { %v1307_v55 = vpop.f32.mrf.mxu0 }
 0x25b   :  { %1622 = vmax.xlane.f32.xlu1 %v3776_v3  ;;  %1616 = vmax.xlane.f32.xlu0 %v3773_v47  ;;  %v3781_v23 = vadd.f32 %v3766_v51, %v1307_v55 }
 0x25c   :  { %v2853_v58 = vpop.f32.mrf.mxu0 }
 0x25d   :  { %v3788_v63 = vadd.f32 %v2853_v58, %v3766_v51 }
 0x25e   :  { %v1317_v59 = vpop.f32.mrf.mxu0 }
 0x25f   :  { %v3784_v60 = vadd.f32 %v3766_v51, %v1317_v59  ;;  %1620 = vmax.xlane.f32.xlu1 %v3781_v23 }
 0x260   :  { %v2856_v61 = vpop.f32.mrf.mxu0 }
 0x261   :  { %1624 = vmax.xlane.f32.xlu0 %v3784_v60  ;;  %v3796_v2 = vadd.f32 %v2856_v61, %v3766_v51 }
 0x262   :  { %v1327_v13 = vpop.f32.mrf.mxu0 }
 0x263   :  { %v3792_v0 = vadd.f32 %v3766_v51, %v1327_v13  ;;  %1626 = vmax.xlane.f32.xlu1 %v3788_v63 }
 0x264   :  { %v2859_v39 = vpop.f32.mrf.mxu0 }
 0x265   :  { %1628 = vmax.xlane.f32.xlu0 %v3792_v0  ;;  %v3804_v56 = vadd.f32 %v2859_v39, %v3766_v51 }
 0x266   :  { %v1337_v4 = vpop.f32.mrf.mxu0 }
 0x267   :  { %v3800_v31 = vadd.f32 %v3766_v51, %v1337_v4  ;;  %1630 = vmax.xlane.f32.xlu1 %v3796_v2 }
 0x268   :  { %v2862_v5 = vpop.f32.mrf.mxu0 }
 0x269   :  { %1632 = vmax.xlane.f32.xlu0 %v3800_v31  ;;  %v3812_v9 = vadd.f32 %v2862_v5, %v3766_v51 }
 0x26a   :  { %v1347_v6 = vpop.f32.mrf.mxu0 }
 0x26b   :  { %v3808_v7 = vadd.f32 %v3766_v51, %v1347_v6  ;;  %1634 = vmax.xlane.f32.xlu1 %v3804_v56 }
 0x26c   :  { %v2865_v48 = vpop.f32.mrf.mxu0 }
 0x26d   :  { %1636 = vmax.xlane.f32.xlu0 %v3808_v7  ;;  %v3820_v14 = vadd.f32 %v2865_v48, %v3766_v51 }
 0x26e   :  { %v1357_v10 = vpop.f32.mrf.mxu0 }
 0x26f   :  { %v3816_v11 = vadd.f32 %v3766_v51, %v1357_v10  ;;  %1638 = vmax.xlane.f32.xlu1 %v3812_v9 }
 0x270   :  { %v2868_v12 = vpop.f32.mrf.mxu0 }
 0x271   :  { %1640 = vmax.xlane.f32.xlu0 %v3816_v11  ;;  %v3828_v18 = vadd.f32 %v2868_v12, %v3766_v51 }
 0x272   :  { %v1367_v1 = vpop.f32.mrf.mxu0 }
 0x273   :  { %v3824_v15 = vadd.f32 %v3766_v51, %v1367_v1  ;;  %1642 = vmax.xlane.f32.xlu1 %v3820_v14 }
 0x274   :  { %v2871_v16 = vpop.f32.mrf.mxu0 }
 0x275   :  { %1644 = vmax.xlane.f32.xlu0 %v3824_v15  ;;  %v3836_v22 = vadd.f32 %v2871_v16, %v3766_v51 }
 0x276   :  { %v1377_v20 = vpop.f32.mrf.mxu0 }
 0x277   :  { %v3832_v19 = vadd.f32 %v3766_v51, %v1377_v20  ;;  %1646 = vmax.xlane.f32.xlu1 %v3828_v18 }
 0x278   :  { %v2874_v21 = vpop.f32.mrf.mxu0 }
 0x279   :  { %1648 = vmax.xlane.f32.xlu0 %v3832_v19  ;;  %v3844_v27 = vadd.f32 %v2874_v21, %v3766_v51 }
 0x27a   :  { %v1387_v24 = vpop.f32.mrf.mxu0 }
 0x27b   :  { %v3840_v25 = vadd.f32 %v3766_v51, %v1387_v24  ;;  %1650 = vmax.xlane.f32.xlu1 %v3836_v22 }
 0x27c   :  { %v2877_v26 = vpop.f32.mrf.mxu0 }
 0x27d   :  { %1652 = vmax.xlane.f32.xlu0 %v3840_v25  ;;  %v3852_v32 = vadd.f32 %v2877_v26, %v3766_v51 }
 0x27e   :  { %v1397_v28 = vpop.f32.mrf.mxu0 }
 0x27f   :  { %v3848_v29 = vadd.f32 %v3766_v51, %v1397_v28  ;;  %1654 = vmax.xlane.f32.xlu1 %v3844_v27 }
 0x280   :  { %v2880_v30 = vpop.f32.mrf.mxu0 }
 0x281   :  { %1656 = vmax.xlane.f32.xlu0 %v3848_v29  ;;  %v3860_v36 = vadd.f32 %v2880_v30, %v3766_v51 }
 0x282   :  { %v1407_v33 = vpop.f32.mrf.mxu0 }
 0x283   :  { %v3856_v34 = vadd.f32 %v3766_v51, %v1407_v33  ;;  %1658 = vmax.xlane.f32.xlu1 %v3852_v32 }
 0x284   :  { %v2883_v35 = vpop.f32.mrf.mxu0 }
 0x285   :  { %1660 = vmax.xlane.f32.xlu0 %v3856_v34  ;;  %v3868_v41 = vadd.f32 %v2883_v35, %v3766_v51 }
 0x286   :  { %v1417_v38 = vpop.f32.mrf.mxu0 }
 0x287   :  { %v3864_v42 = vadd.f32 %v3766_v51, %v1417_v38  ;;  %1662 = vmax.xlane.f32.xlu1 %v3860_v36 }
 0x288   :  { %v2886_v40 = vpop.f32.mrf.mxu0 }
 0x289   :  { %1664 = vmax.xlane.f32.xlu0 %v3864_v42  ;;  %v3876_v45 = vadd.f32 %v2886_v40, %v3766_v51 }
 0x28a   :  { %v1427_v43 = vpop.f32.mrf.mxu0 }
 0x28b   :  { %v3872_v37 = vadd.f32 %v3766_v51, %v1427_v43  ;;  %1666 = vmax.xlane.f32.xlu1 %v3868_v41 }
 0x28c   :  { %v2889_v44 = vpop.f32.mrf.mxu0 }
 0x28d   :  { %1668 = vmax.xlane.f32.xlu0 %v3872_v37  ;;  %v3884_v50 = vadd.f32 %v2889_v44, %v3766_v51 }
 0x28e   :  { %v1437_v52 = vpop.f32.mrf.mxu0 }
 0x28f   :  { %v3880_v46 = vadd.f32 %v3766_v51, %v1437_v52  ;;  %1670 = vmax.xlane.f32.xlu1 %v3876_v45 }
 0x290   :  { %v2892_v49 = vpop.f32.mrf.mxu0 }
 0x291   :  { %1672 = vmax.xlane.f32.xlu0 %v3880_v46  ;;  %v3892_v8 = vadd.f32 %v2892_v49, %v3766_v51 }
 0x292   :  { %v1447_v62 = vpop.f32.mrf.mxu0 }
 0x293   :  { %v3888_v57 = vadd.f32 %v3766_v51, %v1447_v62  ;;  %1674 = vmax.xlane.f32.xlu1 %v3884_v50 }
 0x294   :  { %v2895_v53 = vpop.f32.mrf.mxu0 }
 0x295   :  { %1676 = vmax.xlane.f32.xlu0 %v3888_v57  ;;  %v3900_v59 = vadd.f32 %v2895_v53, %v3766_v51 }
 0x296   :  { %v1457_v54 = vpop.f32.mrf.mxu0 }
 0x297   :  { %v3896_v55 = vadd.f32 %v3766_v51, %v1457_v54  ;;  %1678 = vmax.xlane.f32.xlu1 %v3892_v8 }
 0x298   :  { %v2898_v58 = vpop.f32.mrf.mxu0 }
 0x299   :  { %1680 = vmax.xlane.f32.xlu0 %v3896_v55  ;;  %v3908_v4 = vadd.f32 %v2898_v58, %v3766_v51 }
 0x29a   :  { %v1467_v61 = vpop.f32.mrf.mxu0 }
 0x29b   :  { %v3904_v13 = vadd.f32 %v3766_v51, %v1467_v61  ;;  %1682 = vmax.xlane.f32.xlu1 %v3900_v59 }
 0x29c   :  { %v2901_v39 = vpop.f32.mrf.mxu0 }
 0x29d   :  { %1684 = vmax.xlane.f32.xlu0 %v3904_v13  ;;  %v3916_v10 = vadd.f32 %v2901_v39, %v3766_v51 }
 0x29e   :  { %v1477_v5 = vpop.f32.mrf.mxu0 }
 0x29f   :  { %v3912_v6 = vadd.f32 %v3766_v51, %v1477_v5  ;;  %1686 = vmax.xlane.f32.xlu1 %v3908_v4 }
 0x2a0   :  { %v2904_v48 = vpop.f32.mrf.mxu0 }
 0x2a1   :  { %1688 = vmax.xlane.f32.xlu0 %v3912_v6  ;;  %v3924_v20 = vadd.f32 %v2904_v48, %v3766_v51 }
 0x2a2   :  { %v1487_v12 = vpop.f32.mrf.mxu0 }
 0x2a3   :  { %v3920_v1 = vadd.f32 %v3766_v51, %v1487_v12  ;;  %1690 = vmax.xlane.f32.xlu1 %v3916_v10 }
 0x2a4   :  { %v2907_v16 = vpop.f32.mrf.mxu0 }
 0x2a5   :  { %1692 = vmax.xlane.f32.xlu0 %v3920_v1  ;;  %v3932_v28 = vadd.f32 %v2907_v16, %v3766_v51 }
 0x2a6   :  { %v1497_v21 = vpop.f32.mrf.mxu0 }
 0x2a7   :  { %v3928_v24 = vadd.f32 %v3766_v51, %v1497_v21  ;;  %1694 = vmax.xlane.f32.xlu1 %v3924_v20 }
 0x2a8   :  { %v2910_v26 = vpop.f32.mrf.mxu0 }
 0x2a9   :  { %1696 = vmax.xlane.f32.xlu0 %v3928_v24  ;;  %v3940_v38 = vadd.f32 %v2910_v26, %v3766_v51 }
 0x2aa   :  { %v1507_v30 = vpop.f32.mrf.mxu0 }
 0x2ab   :  { %v3936_v33 = vadd.f32 %v3766_v51, %v1507_v30  ;;  %1698 = vmax.xlane.f32.xlu1 %v3932_v28 }
 0x2ac   :  { %v2913_v35 = vpop.f32.mrf.mxu0 }
 0x2ad   :  { %1700 = vmax.xlane.f32.xlu0 %v3936_v33  ;;  %v3948_v52 = vadd.f32 %v2913_v35, %v3766_v51 }
 0x2ae   :  { %v1517_v40 = vpop.f32.mrf.mxu0 }
 0x2af   :  { %v3944_v43 = vadd.f32 %v3766_v51, %v1517_v40  ;;  %1702 = vmax.xlane.f32.xlu1 %v3940_v38 }
 0x2b0   :  { %v2916_v44 = vpop.f32.mrf.mxu0 }
 0x2b1   :  { %1704 = vmax.xlane.f32.xlu0 %v3944_v43  ;;  %v3956_v54 = vadd.f32 %v2916_v44, %v3766_v51 }
 0x2b2   :  { %v1527_v49 = vpop.f32.mrf.mxu0 }
 0x2b3   :  { %v3952_v62 = vadd.f32 %v3766_v51, %v1527_v49  ;;  %1706 = vmax.xlane.f32.xlu1 %v3948_v52 }
 0x2b4   :  { %v2919_v53 = vpop.f32.mrf.mxu0 }
 0x2b5   :  { %1708 = vmax.xlane.f32.xlu0 %v3952_v62  ;;  %v3964_v5 = vadd.f32 %v2919_v53, %v3766_v51 }
 0x2b6   :  { %v1537_v58 = vpop.f32.mrf.mxu0 }
 0x2b7   :  { %v3960_v61 = vadd.f32 %v3766_v51, %v1537_v58  ;;  %1710 = vmax.xlane.f32.xlu1 %v3956_v54 }
 0x2b8   :  { %v2922_v39 = vpop.f32.mrf.mxu0 }
 0x2b9   :  { %1712 = vmax.xlane.f32.xlu0 %v3960_v61  ;;  %v3972_v21 = vadd.f32 %v2922_v39, %v3766_v51 }
 0x2ba   :  { %v1547_v48 = vpop.f32.mrf.mxu0 }
 0x2bb   :  { %v3968_v12 = vadd.f32 %v3766_v51, %v1547_v48  ;;  %1714 = vmax.xlane.f32.xlu1 %v3964_v5  ;;  %4565 = vst [vmem:[#allocation3_spill] sm:$0xff] %v3972_v21 }
 0x2bc   :  { %v2925_v16 = vpop.f32.mrf.mxu0 }
 0x2bd   :  { %4564 = vst [vmem:[#allocation2_spill] sm:$0xff] %v3968_v12  ;;  %1716 = vmax.xlane.f32.xlu0 %v3968_v12  ;;  %v3980_v40 = vadd.f32 %v2925_v16, %v3766_v51 }
 0x2be   :  { %v1557_v26 = vpop.f32.mrf.mxu0 }
 0x2bf   :  { %v3976_v30 = vadd.f32 %v3766_v51, %v1557_v26  ;;  %1718 = vmax.xlane.f32.xlu1 %v3972_v21  ;;  %4567 = vst [vmem:[#allocation5_spill] sm:$0xff] %v3980_v40 }
 0x2c0   :  { %v2928_v35 = vpop.f32.mrf.mxu0 }
 0x2c1   :  { %4566 = vst [vmem:[#allocation4_spill] sm:$0xff] %v3976_v30  ;;  %1720 = vmax.xlane.f32.xlu0 %v3976_v30  ;;  %v3988_v58 = vadd.f32 %v2928_v35, %v3766_v51 }
 0x2c2   :  { %v1567_v44 = vpop.f32.mrf.mxu0 }
 0x2c3   :  { %v3984_v49 = vadd.f32 %v3766_v51, %v1567_v44  ;;  %1722 = vmax.xlane.f32.xlu1 %v3980_v40  ;;  %4569 = vst [vmem:[#allocation7_spill] sm:$0xff] %v3988_v58 }
 0x2c4   :  { %v2931_v53 = vpop.f32.mrf.mxu0 }
 0x2c5   :  { %4568 = vst [vmem:[#allocation6_spill] sm:$0xff] %v3984_v49  ;;  %1724 = vmax.xlane.f32.xlu0 %v3984_v49  ;;  %v3996_v26 = vadd.f32 %v2931_v53, %v3766_v51 }
 0x2c6   :  { %v1577_v39 = vpop.f32.mrf.mxu0 }
 0x2c7   :  { %v3992_v48 = vadd.f32 %v3766_v51, %v1577_v39  ;;  %1726 = vmax.xlane.f32.xlu1 %v3988_v58  ;;  %4571 = vst [vmem:[#allocation9_spill] sm:$0xff] %v3996_v26 }
 0x2c8   :  { %v2934_v16 = vpop.f32.mrf.mxu0 }
 0x2c9   :  { %4570 = vst [vmem:[#allocation8_spill] sm:$0xff] %v3992_v48  ;;  %1728 = vmax.xlane.f32.xlu0 %v3992_v48  ;;  %v4004_v49 = vadd.f32 %v2934_v16, %v3766_v51 }
 0x2ca   :  { %v1587_v44 = vpop.f32.mrf.mxu0 }
 0x2cb   :  { %v4000_v40 = vadd.f32 %v3766_v51, %v1587_v44  ;;  %1730 = vmax.xlane.f32.xlu1 %v3996_v26  ;;  %4573 = vst [vmem:[#allocation11_spill] sm:$0xff] %v4004_v49 }
 0x2cc   :  { %v2937_v35 = vpop.f32.mrf.mxu0 }
 0x2cd   :  { %4572 = vst [vmem:[#allocation10_spill] sm:$0xff] %v4000_v40  ;;  %1732 = vmax.xlane.f32.xlu0 %v4000_v40  ;;  %v4012_v48 = vadd.f32 %v2937_v35, %v3766_v51 }
 0x2ce   :  { %v1597_v39 = vpop.f32.mrf.mxu0 }
 0x2cf   :  { %v4008_v58 = vadd.f32 %v3766_v51, %v1597_v39  ;;  %1734 = vmax.xlane.f32.xlu1 %v4004_v49  ;;  %4575 = vst [vmem:[#allocation13_spill] sm:$0xff] %v4012_v48 }
 0x2d0   :  { %v2940_v53 = vpop.f32.mrf.mxu0 }
 0x2d1   :  { %4574 = vst [vmem:[#allocation12_spill] sm:$0xff] %v4008_v58  ;;  %1736 = vmax.xlane.f32.xlu0 %v4008_v58  ;;  %v4020_v16 = vadd.f32 %v2940_v53, %v3766_v51 }
 0x2d2   :  { %v1607_v44 = vpop.f32.mrf.mxu0 }
 0x2d3   :  { %v4016_v26 = vadd.f32 %v3766_v51, %v1607_v44  ;;  %1738 = vmax.xlane.f32.xlu1 %v4012_v48  ;;  %4577 = vst [vmem:[#allocation15_spill] sm:$0xff] %v4020_v16 }
 0x2d5   :  { %4576 = vst [vmem:[#allocation14_spill] sm:$0xff] %v4016_v26  ;;  %1740 = vmax.xlane.f32.xlu0 %v4016_v26 }
 0x2d7   :  { %1742 = vmax.xlane.f32.xlu1 %v4020_v16 }
 0x2e0   :  { %v1619_v39 = vpop.xlane.xlu0 %1618 }
 0x2e1   :  { %v1745_v49 = vsub.f32 %v3769_v17, %v1619_v39 }
 0x2e3   :  { %v1810_v35 = vmul.f32 1.442695, %v1745_v49 }
 0x2e4   :  { %v1623_v40 = vpop.xlane.xlu1 %1622  ;;  %v1617_v30 = vpop.xlane.xlu0 %1616 }
 0x2e5   :  { %2943 = vpow2.f32 %v1810_v35  ;;  %v1747_v58 = vsub.f32 %v3776_v3, %v1623_v40  ;;  %v1744_v44 = vsub.f32 %v3773_v47, %v1617_v30 }
 0x2e7   :  { %v1814_v21 = vmul.f32 1.442695, %v1747_v58  ;;  %v1808_v48 = vmul.f32 1.442695, %v1744_v44 }
 0x2e8   :  { %v1621_v12 = vpop.xlane.xlu1 %1620 }
 0x2e9   :  { %2945 = vpow2.f32 %v1814_v21  ;;  %v1746_v51 = vsub.f32 %v3781_v23, %v1621_v12 }
 0x2ea   :  { %2947 = vpow2.f32 %v1808_v48  ;;  %v1625_v53 = vpop.xlane.xlu0 %1624 }
 0x2eb   :  { %v1812_v16 = vmul.f32 1.442695, %v1746_v51  ;;  %v1748_v26 = vsub.f32 %v3784_v60, %v1625_v53 }
 0x2ec   :  { %v1627_v17 = vpop.xlane.xlu1 %1626 }
 0x2ed   :  { %2949 = vpow2.f32 %v1812_v16  ;;  %v1749_v49 = vsub.f32 %v3788_v63, %v1627_v17  ;;  %v1816_v39 = vmul.f32 1.442695, %v1748_v26 }
 0x2ee   :  { %v1629_v35 = vpop.xlane.xlu0 %1628 }
 0x2ef   :  { %v1818_v3 = vmul.f32 1.442695, %v1749_v49  ;;  %v1750_v47 = vsub.f32 %v3792_v0, %v1629_v35 }
 0x2f0   :  { %v1631_v30 = vpop.xlane.xlu1 %1630 }
 0x2f1   :  { %2951 = vpow2.f32 %v1818_v3  ;;  %v1751_v21 = vsub.f32 %v3796_v2, %v1631_v30  ;;  %v1820_v23 = vmul.f32 1.442695, %v1750_v47 }
 0x2f2   :  { %v4032_v40 = vpop.eup %2943  ;;  %2953 = vpow2.f32 %v1816_v39  ;;  %v1633_v12 = vpop.xlane.xlu0 %1632 }
 0x2f3   :  { %v1822_v58 = vmul.f32 1.442695, %v1751_v21  ;;  %v1752_v60 = vsub.f32 %v3800_v31, %v1633_v12  ;;  %1938 = vadd.xlane.f32.xlu1 %v4032_v40 }
 0x2f4   :  { %v1635_v63 = vpop.xlane.xlu1 %1634 }
 0x2f5   :  { %2955 = vpow2.f32 %v1822_v58  ;;  %v1753_v48 = vsub.f32 %v3804_v56, %v1635_v63  ;;  %v1824_v0 = vmul.f32 1.442695, %v1752_v60 }
 0x2f6   :  { %v4037_v26 = vpop.eup %2945  ;;  %2957 = vpow2.f32 %v1820_v23  ;;  %v1637_v16 = vpop.xlane.xlu0 %1636 }
 0x2f7   :  { %v4039_v2 = vpop.eup %2947  ;;  %v1826_v44 = vmul.f32 1.442695, %v1753_v48  ;;  %v1754_v51 = vsub.f32 %v3808_v7, %v1637_v16  ;;  %1942 = vadd.xlane.f32.xlu1 %v4037_v26 }
 0x2f8   :  { %1936 = vadd.xlane.f32.xlu0 %v4039_v2  ;;  %v1639_v31 = vpop.xlane.xlu1 %1638 }
 0x2f9   :  { %2959 = vpow2.f32 %v1826_v44  ;;  %v1755_v53 = vsub.f32 %v3812_v9, %v1639_v31  ;;  %v1828_v56 = vmul.f32 1.442695, %v1754_v51 }
 0x2fa   :  { %v4045_v17 = vpop.eup %2949  ;;  %2961 = vpow2.f32 %v1824_v0  ;;  %v1641_v49 = vpop.xlane.xlu0 %1640 }
 0x2fb   :  { %v1830_v39 = vmul.f32 1.442695, %v1755_v53  ;;  %v1756_v35 = vsub.f32 %v3816_v11, %v1641_v49 }
 0x2fc   :  { %1940 = vadd.xlane.f32.xlu0 %v4045_v17  ;;  %v1643_v3 = vpop.xlane.xlu1 %1642 }
 0x2fd   :  { %2963 = vpow2.f32 %v1830_v39  ;;  %v1757_v7 = vsub.f32 %v3820_v14, %v1643_v3  ;;  %v1832_v30 = vmul.f32 1.442695, %v1756_v35 }
 0x2fe   :  { %v4050_v47 = vpop.eup %2951  ;;  %2965 = vpow2.f32 %v1828_v56  ;;  %v1645_v21 = vpop.xlane.xlu0 %1644 }
 0x2ff   :  { %v4052_v9 = vpop.eup %2953  ;;  %v1834_v23 = vmul.f32 1.442695, %v1757_v7  ;;  %v1758_v12 = vsub.f32 %v3824_v15, %v1645_v21  ;;  %1946 = vadd.xlane.f32.xlu1 %v4050_v47 }
 0x300   :  { %1944 = vadd.xlane.f32.xlu0 %v4052_v9  ;;  %v1647_v11 = vpop.xlane.xlu1 %1646 }
 0x301   :  { %2967 = vpow2.f32 %v1834_v23  ;;  %v1759_v58 = vsub.f32 %v3828_v18, %v1647_v11  ;;  %v1836_v14 = vmul.f32 1.442695, %v1758_v12 }
 0x302   :  { %v4058_v60 = vpop.eup %2955  ;;  %2969 = vpow2.f32 %v1832_v30  ;;  %v1649_v63 = vpop.xlane.xlu0 %1648 }
 0x303   :  { %v4060_v48 = vpop.eup %2957  ;;  %v1838_v0 = vmul.f32 1.442695, %v1759_v58  ;;  %v1760_v16 = vsub.f32 %v3832_v19, %v1649_v63  ;;  %1950 = vadd.xlane.f32.xlu1 %v4058_v60 }
 0x304   :  { %1948 = vadd.xlane.f32.xlu0 %v4060_v48  ;;  %v1651_v15 = vpop.xlane.xlu1 %1650 }
 0x305   :  { %2971 = vpow2.f32 %v1838_v0  ;;  %v1761_v44 = vsub.f32 %v3836_v22, %v1651_v15  ;;  %v1840_v18 = vmul.f32 1.442695, %v1760_v16 }
 0x306   :  { %v4066_v51 = vpop.eup %2959  ;;  %2973 = vpow2.f32 %v1836_v14  ;;  %v1653_v31 = vpop.xlane.xlu0 %1652 }
 0x307   :  { %v4068_v53 = vpop.eup %2961  ;;  %v1842_v56 = vmul.f32 1.442695, %v1761_v44  ;;  %v1762_v49 = vsub.f32 %v3840_v25, %v1653_v31  ;;  %1954 = vadd.xlane.f32.xlu1 %v4066_v51 }
 0x308   :  { %1952 = vadd.xlane.f32.xlu0 %v4068_v53  ;;  %v1655_v19 = vpop.xlane.xlu1 %1654 }
 0x309   :  { %2975 = vpow2.f32 %v1842_v56  ;;  %v1763_v39 = vsub.f32 %v3844_v27, %v1655_v19  ;;  %v1844_v22 = vmul.f32 1.442695, %v1762_v49 }
 0x30a   :  { %v4074_v35 = vpop.eup %2963  ;;  %2977 = vpow2.f32 %v1840_v18  ;;  %v1657_v3 = vpop.xlane.xlu0 %1656 }
 0x30b   :  { %v4076_v7 = vpop.eup %2965  ;;  %v1846_v30 = vmul.f32 1.442695, %v1763_v39  ;;  %v1764_v21 = vsub.f32 %v3848_v29, %v1657_v3  ;;  %1958 = vadd.xlane.f32.xlu1 %v4074_v35 }
 0x30c   :  { %1956 = vadd.xlane.f32.xlu0 %v4076_v7  ;;  %v1659_v25 = vpop.xlane.xlu1 %1658 }
 0x30d   :  { %2979 = vpow2.f32 %v1846_v30  ;;  %v1765_v23 = vsub.f32 %v3852_v32, %v1659_v25  ;;  %v1848_v27 = vmul.f32 1.442695, %v1764_v21 }
 0x30e   :  { %v4082_v12 = vpop.eup %2967  ;;  %2981 = vpow2.f32 %v1844_v22  ;;  %v1661_v11 = vpop.xlane.xlu0 %1660 }
 0x30f   :  { %v4084_v58 = vpop.eup %2969  ;;  %v1850_v14 = vmul.f32 1.442695, %v1765_v23  ;;  %v1766_v63 = vsub.f32 %v3856_v34, %v1661_v11  ;;  %1962 = vadd.xlane.f32.xlu1 %v4082_v12 }
 0x310   :  { %1960 = vadd.xlane.f32.xlu0 %v4084_v58  ;;  %v1663_v29 = vpop.xlane.xlu1 %1662 }
 0x311   :  { %2983 = vpow2.f32 %v1850_v14  ;;  %v1767_v0 = vsub.f32 %v3860_v36, %v1663_v29  ;;  %v1852_v32 = vmul.f32 1.442695, %v1766_v63 }
 0x312   :  { %v4090_v16 = vpop.eup %2971  ;;  %2985 = vpow2.f32 %v1848_v27  ;;  %v1665_v15 = vpop.xlane.xlu0 %1664 }
 0x313   :  { %v4092_v44 = vpop.eup %2973  ;;  %v1854_v18 = vmul.f32 1.442695, %v1767_v0  ;;  %v1768_v31 = vsub.f32 %v3864_v42, %v1665_v15  ;;  %1966 = vadd.xlane.f32.xlu1 %v4090_v16 }
 0x314   :  { %1964 = vadd.xlane.f32.xlu0 %v4092_v44  ;;  %v1667_v34 = vpop.xlane.xlu1 %1666 }
 0x315   :  { %2987 = vpow2.f32 %v1854_v18  ;;  %v1769_v56 = vsub.f32 %v3868_v41, %v1667_v34  ;;  %v1856_v36 = vmul.f32 1.442695, %v1768_v31 }
 0x316   :  { %v4098_v49 = vpop.eup %2975  ;;  %2989 = vpow2.f32 %v1852_v32  ;;  %v1669_v19 = vpop.xlane.xlu0 %1668 }
 0x317   :  { %v4100_v39 = vpop.eup %2977  ;;  %v1858_v22 = vmul.f32 1.442695, %v1769_v56  ;;  %v1770_v3 = vsub.f32 %v3872_v37, %v1669_v19  ;;  %1970 = vadd.xlane.f32.xlu1 %v4098_v49 }
 0x318   :  { %1968 = vadd.xlane.f32.xlu0 %v4100_v39  ;;  %v1671_v42 = vpop.xlane.xlu1 %1670 }
 0x319   :  { %2991 = vpow2.f32 %v1858_v22  ;;  %v1771_v30 = vsub.f32 %v3876_v45, %v1671_v42  ;;  %v1860_v41 = vmul.f32 1.442695, %v1770_v3 }
 0x31a   :  { %v4106_v21 = vpop.eup %2979  ;;  %2993 = vpow2.f32 %v1856_v36  ;;  %v1673_v25 = vpop.xlane.xlu0 %1672 }
 0x31b   :  { %v4108_v23 = vpop.eup %2981  ;;  %v1862_v27 = vmul.f32 1.442695, %v1771_v30  ;;  %v1772_v11 = vsub.f32 %v3880_v46, %v1673_v25  ;;  %1974 = vadd.xlane.f32.xlu1 %v4106_v21 }
 0x31c   :  { %1972 = vadd.xlane.f32.xlu0 %v4108_v23  ;;  %v1675_v37 = vpop.xlane.xlu1 %1674 }
 0x31d   :  { %2995 = vpow2.f32 %v1862_v27  ;;  %v1773_v14 = vsub.f32 %v3884_v50, %v1675_v37  ;;  %v1864_v45 = vmul.f32 1.442695, %v1772_v11 }
 0x31e   :  { %v4114_v63 = vpop.eup %2983  ;;  %2997 = vpow2.f32 %v1860_v41  ;;  %v1677_v29 = vpop.xlane.xlu0 %1676 }
 0x31f   :  { %v4116_v0 = vpop.eup %2985  ;;  %v1866_v32 = vmul.f32 1.442695, %v1773_v14  ;;  %v1774_v15 = vsub.f32 %v3888_v57, %v1677_v29  ;;  %1978 = vadd.xlane.f32.xlu1 %v4114_v63 }
 0x320   :  { %1976 = vadd.xlane.f32.xlu0 %v4116_v0  ;;  %v1679_v46 = vpop.xlane.xlu1 %1678 }
 0x321   :  { %2999 = vpow2.f32 %v1866_v32  ;;  %v1775_v18 = vsub.f32 %v3892_v8, %v1679_v46  ;;  %v1868_v50 = vmul.f32 1.442695, %v1774_v15 }
 0x322   :  { %v4122_v31 = vpop.eup %2987  ;;  %3001 = vpow2.f32 %v1864_v45  ;;  %v1681_v34 = vpop.xlane.xlu0 %1680 }
 0x323   :  { %v4124_v56 = vpop.eup %2989  ;;  %v1870_v36 = vmul.f32 1.442695, %v1775_v18  ;;  %v1776_v19 = vsub.f32 %v3896_v55, %v1681_v34  ;;  %1982 = vadd.xlane.f32.xlu1 %v4122_v31 }
 0x324   :  { %1980 = vadd.xlane.f32.xlu0 %v4124_v56  ;;  %v1683_v57 = vpop.xlane.xlu1 %1682 }
 0x325   :  { %3003 = vpow2.f32 %v1870_v36  ;;  %v1777_v22 = vsub.f32 %v3900_v59, %v1683_v57  ;;  %v1872_v8 = vmul.f32 1.442695, %v1776_v19 }
 0x326   :  { %v4130_v3 = vpop.eup %2991  ;;  %3005 = vpow2.f32 %v1868_v50  ;;  %v1685_v42 = vpop.xlane.xlu0 %1684 }
 0x327   :  { %v4132_v30 = vpop.eup %2993  ;;  %v1874_v41 = vmul.f32 1.442695, %v1777_v22  ;;  %v1778_v25 = vsub.f32 %v3904_v13, %v1685_v42  ;;  %1986 = vadd.xlane.f32.xlu1 %v4130_v3 }
 0x328   :  { %1984 = vadd.xlane.f32.xlu0 %v4132_v30  ;;  %v1687_v55 = vpop.xlane.xlu1 %1686 }
 0x329   :  { %3007 = vpow2.f32 %v1874_v41  ;;  %v1779_v27 = vsub.f32 %v3908_v4, %v1687_v55  ;;  %v1876_v59 = vmul.f32 1.442695, %v1778_v25 }
 0x32a   :  { %v4138_v11 = vpop.eup %2995  ;;  %3009 = vpow2.f32 %v1872_v8  ;;  %v1689_v37 = vpop.xlane.xlu0 %1688 }
 0x32b   :  { %v4140_v14 = vpop.eup %2997  ;;  %v1878_v45 = vmul.f32 1.442695, %v1779_v27  ;;  %v1780_v29 = vsub.f32 %v3912_v6, %v1689_v37  ;;  %1990 = vadd.xlane.f32.xlu1 %v4138_v11 }
 0x32c   :  { %1988 = vadd.xlane.f32.xlu0 %v4140_v14  ;;  %v1691_v13 = vpop.xlane.xlu1 %1690 }
 0x32d   :  { %3011 = vpow2.f32 %v1878_v45  ;;  %v1781_v32 = vsub.f32 %v3916_v10, %v1691_v13  ;;  %v1880_v4 = vmul.f32 1.442695, %v1780_v29 }
 0x32e   :  { %v4146_v15 = vpop.eup %2999  ;;  %3013 = vpow2.f32 %v1876_v59  ;;  %v1693_v46 = vpop.xlane.xlu0 %1692 }
 0x32f   :  { %v4148_v18 = vpop.eup %3001  ;;  %v1882_v50 = vmul.f32 1.442695, %v1781_v32  ;;  %v1782_v34 = vsub.f32 %v3920_v1, %v1693_v46  ;;  %1994 = vadd.xlane.f32.xlu1 %v4146_v15 }
 0x330   :  { %1992 = vadd.xlane.f32.xlu0 %v4148_v18  ;;  %v1695_v6 = vpop.xlane.xlu1 %1694 }
 0x331   :  { %3015 = vpow2.f32 %v1882_v50  ;;  %v1783_v36 = vsub.f32 %v3924_v20, %v1695_v6  ;;  %v1884_v10 = vmul.f32 1.442695, %v1782_v34 }
 0x332   :  { %v4154_v19 = vpop.eup %3003  ;;  %3017 = vpow2.f32 %v1880_v4  ;;  %v1697_v57 = vpop.xlane.xlu0 %1696 }
 0x333   :  { %v4156_v22 = vpop.eup %3005  ;;  %v1886_v8 = vmul.f32 1.442695, %v1783_v36  ;;  %v1784_v42 = vsub.f32 %v3928_v24, %v1697_v57  ;;  %1998 = vadd.xlane.f32.xlu1 %v4154_v19 }
 0x334   :  { %1996 = vadd.xlane.f32.xlu0 %v4156_v22  ;;  %v1699_v1 = vpop.xlane.xlu1 %1698 }
 0x335   :  { %3019 = vpow2.f32 %v1886_v8  ;;  %v1785_v41 = vsub.f32 %v3932_v28, %v1699_v1  ;;  %v1888_v20 = vmul.f32 1.442695, %v1784_v42 }
 0x336   :  { %v4162_v25 = vpop.eup %3007  ;;  %3021 = vpow2.f32 %v1884_v10  ;;  %v1701_v55 = vpop.xlane.xlu0 %1700 }
 0x337   :  { %v4164_v27 = vpop.eup %3009  ;;  %v1890_v59 = vmul.f32 1.442695, %v1785_v41  ;;  %v1786_v37 = vsub.f32 %v3936_v33, %v1701_v55  ;;  %2002 = vadd.xlane.f32.xlu1 %v4162_v25 }
 0x338   :  { %2000 = vadd.xlane.f32.xlu0 %v4164_v27  ;;  %v1703_v24 = vpop.xlane.xlu1 %1702 }
 0x339   :  { %3023 = vpow2.f32 %v1890_v59  ;;  %v1787_v45 = vsub.f32 %v3940_v38, %v1703_v24  ;;  %v1892_v28 = vmul.f32 1.442695, %v1786_v37 }
 0x33a   :  { %v4170_v29 = vpop.eup %3011  ;;  %3025 = vpow2.f32 %v1888_v20  ;;  %v1705_v13 = vpop.xlane.xlu0 %1704 }
 0x33b   :  { %v4172_v32 = vpop.eup %3013  ;;  %v1894_v4 = vmul.f32 1.442695, %v1787_v45  ;;  %v1788_v46 = vsub.f32 %v3944_v43, %v1705_v13  ;;  %2006 = vadd.xlane.f32.xlu1 %v4170_v29  ;;  %v4578_v13 = vld [vmem:[#allocation2_spill] sm:$0xff] }
 0x33c   :  { %2004 = vadd.xlane.f32.xlu0 %v4172_v32  ;;  %v1707_v33 = vpop.xlane.xlu1 %1706 }
 0x33d   :  { %3027 = vpow2.f32 %v1894_v4  ;;  %v1789_v50 = vsub.f32 %v3948_v52, %v1707_v33  ;;  %v1896_v38 = vmul.f32 1.442695, %v1788_v46  ;;  %v4579_v46 = vld [vmem:[#allocation3_spill] sm:$0xff] }
 0x33e   :  { %v4178_v34 = vpop.eup %3015  ;;  %3029 = vpow2.f32 %v1892_v28  ;;  %v1709_v6 = vpop.xlane.xlu0 %1708 }
 0x33f   :  { %v4180_v36 = vpop.eup %3017  ;;  %v1898_v10 = vmul.f32 1.442695, %v1789_v50  ;;  %v1790_v57 = vsub.f32 %v3952_v62, %v1709_v6  ;;  %2010 = vadd.xlane.f32.xlu1 %v4178_v34 }
 0x340   :  { %2008 = vadd.xlane.f32.xlu0 %v4180_v36  ;;  %v1711_v43 = vpop.xlane.xlu1 %1710 }
 0x341   :  { %3031 = vpow2.f32 %v1898_v10  ;;  %v1791_v8 = vsub.f32 %v3956_v54, %v1711_v43  ;;  %v1900_v52 = vmul.f32 1.442695, %v1790_v57  ;;  %v4580_v57 = vld [vmem:[#allocation4_spill] sm:$0xff] }
 0x342   :  { %v4186_v42 = vpop.eup %3019  ;;  %3033 = vpow2.f32 %v1896_v38  ;;  %v1713_v1 = vpop.xlane.xlu0 %1712 }
 0x343   :  { %v4188_v41 = vpop.eup %3021  ;;  %v1902_v20 = vmul.f32 1.442695, %v1791_v8  ;;  %v1792_v55 = vsub.f32 %v3960_v61, %v1713_v1  ;;  %2014 = vadd.xlane.f32.xlu1 %v4186_v42 }
 0x344   :  { %2012 = vadd.xlane.f32.xlu0 %v4188_v41  ;;  %v1715_v62 = vpop.xlane.xlu1 %1714 }
 0x345   :  { %3035 = vpow2.f32 %v1902_v20  ;;  %v1793_v59 = vsub.f32 %v3964_v5, %v1715_v62  ;;  %v1904_v54 = vmul.f32 1.442695, %v1792_v55 }
 0x346   :  { %v4194_v37 = vpop.eup %3023  ;;  %3037 = vpow2.f32 %v1900_v52  ;;  %v1717_v24 = vpop.xlane.xlu0 %1716  ;;  %v4581_v52 = vld [vmem:[#allocation5_spill] sm:$0xff] }
 0x347   :  { %v4196_v45 = vpop.eup %3025  ;;  %v1906_v28 = vmul.f32 1.442695, %v1793_v59  ;;  %v1794_v4 = vsub.f32 %v4578_v13, %v1717_v24  ;;  %2018 = vadd.xlane.f32.xlu1 %v4194_v37  ;;  %v4582_v24 = vld [vmem:[#allocation6_spill] sm:$0xff] }
 0x348   :  { %2016 = vadd.xlane.f32.xlu0 %v4196_v45  ;;  %v1719_v61 = vpop.xlane.xlu1 %1718 }
 0x349   :  { %3039 = vpow2.f32 %v1906_v28  ;;  %v1795_v33 = vsub.f32 %v4579_v46, %v1719_v61  ;;  %v1908_v5 = vmul.f32 1.442695, %v1794_v4  ;;  %v4583_v4 = vld [vmem:[#allocation7_spill] sm:$0xff] }
 0x34a   :  { %v4202_v50 = vpop.eup %3027  ;;  %3041 = vpow2.f32 %v1904_v54  ;;  %v1721_v38 = vpop.xlane.xlu0 %1720 }
 0x34b   :  { %v4204_v6 = vpop.eup %3029  ;;  %v1910_v10 = vmul.f32 1.442695, %v1795_v33  ;;  %v1796_v43 = vsub.f32 %v4580_v57, %v1721_v38  ;;  %2022 = vadd.xlane.f32.xlu1 %v4202_v50  ;;  %v4585_v57 = vld [vmem:[#allocation8_spill] sm:$0xff] }
 0x34c   :  { %2020 = vadd.xlane.f32.xlu0 %v4204_v6  ;;  %v1723_v8 = vpop.xlane.xlu1 %1722 }
 0x34d   :  { %3043 = vpow2.f32 %v1910_v10  ;;  %v1797_v1 = vsub.f32 %v4581_v52, %v1723_v8  ;;  %v1912_v55 = vmul.f32 1.442695, %v1796_v43  ;;  %v4586_v52 = vld [vmem:[#allocation9_spill] sm:$0xff] }
 0x34e   :  { %v4210_v20 = vpop.eup %3031  ;;  %3045 = vpow2.f32 %v1908_v5  ;;  %v1725_v62 = vpop.xlane.xlu0 %1724 }
 0x34f   :  { %v4212_v59 = vpop.eup %3033  ;;  %v1914_v54 = vmul.f32 1.442695, %v1797_v1  ;;  %v1798_v28 = vsub.f32 %v4582_v24, %v1725_v62  ;;  %2026 = vadd.xlane.f32.xlu1 %v4210_v20 }
 0x350   :  { %2024 = vadd.xlane.f32.xlu0 %v4212_v59  ;;  %v1727_v13 = vpop.xlane.xlu1 %1726 }
 0x351   :  { %3047 = vpow2.f32 %v1914_v54  ;;  %v1799_v61 = vsub.f32 %v4583_v4, %v1727_v13  ;;  %v1916_v33 = vmul.f32 1.442695, %v1798_v28  ;;  %v4589_v13 = vld [vmem:[#allocation10_spill] sm:$0xff] }
 0x352   :  { %v4218_v46 = vpop.eup %3035  ;;  %3049 = vpow2.f32 %v1912_v55  ;;  %v1729_v5 = vpop.xlane.xlu0 %1728 }
 0x353   :  { %v4220_v38 = vpop.eup %3037  ;;  %v1918_v10 = vmul.f32 1.442695, %v1799_v61  ;;  %v1800_v43 = vsub.f32 %v4585_v57, %v1729_v5  ;;  %2030 = vadd.xlane.f32.xlu1 %v4218_v46  ;;  %v4590_v5 = vld [vmem:[#allocation11_spill] sm:$0xff] }
 0x354   :  { %4584 = vst [vmem:[#allocation2_spill] sm:$0xff] %v4220_v38  ;;  %2028 = vadd.xlane.f32.xlu0 %v4220_v38  ;;  %v1731_v8 = vpop.xlane.xlu1 %1730  ;;  %v4592_v38 = vld [vmem:[#allocation12_spill] sm:$0xff] }
 0x355   :  { %3051 = vpow2.f32 %v1918_v10  ;;  %v1801_v1 = vsub.f32 %v4586_v52, %v1731_v8  ;;  %v1920_v54 = vmul.f32 1.442695, %v1800_v43 }
 0x356   :  { %v4226_v62 = vpop.eup %3039  ;;  %3053 = vpow2.f32 %v1916_v33  ;;  %v1733_v55 = vpop.xlane.xlu0 %1732 }
 0x357   :  { %4587 = vst [vmem:[#allocation3_spill] sm:$0xff] %v4226_v62  ;;  %v4228_v24 = vpop.eup %3041  ;;  %v1922_v28 = vmul.f32 1.442695, %v1801_v1  ;;  %v1802_v4 = vsub.f32 %v4589_v13, %v1733_v55  ;;  %2034 = vadd.xlane.f32.xlu1 %v4226_v62  ;;  %v4593_v13 = vld [vmem:[#allocation13_spill] sm:$0xff]  ;;  %v4594_v62 = vld [vmem:[#allocation14_spill] sm:$0xff] }
 0x358   :  { %4588 = vst [vmem:[#allocation4_spill] sm:$0xff] %v4228_v24  ;;  %2032 = vadd.xlane.f32.xlu0 %v4228_v24  ;;  %v1735_v61 = vpop.xlane.xlu1 %1734 }
 0x359   :  { %3055 = vpow2.f32 %v1922_v28  ;;  %v1803_v10 = vsub.f32 %v4590_v5, %v1735_v61  ;;  %v1924_v8 = vmul.f32 1.442695, %v1802_v4 }
 0x35a   :  { %v4234_v57 = vpop.eup %3043  ;;  %3057 = vpow2.f32 %v1920_v54  ;;  %v1737_v33 = vpop.xlane.xlu0 %1736 }
 0x35b   :  { %v4236_v43 = vpop.eup %3045  ;;  %v1926_v52 = vmul.f32 1.442695, %v1803_v10  ;;  %v1804_v1 = vsub.f32 %v4592_v38, %v1737_v33  ;;  %2038 = vadd.xlane.f32.xlu1 %v4234_v57  ;;  %v4595_v33 = vld [vmem:[#allocation15_spill] sm:$0xff] }
 0x35c   :  { %4591 = vst [vmem:[#allocation5_spill] sm:$0xff] %v4236_v43  ;;  %2036 = vadd.xlane.f32.xlu0 %v4236_v43  ;;  %v1739_v55 = vpop.xlane.xlu1 %1738 }
 0x35d   :  { %3059 = vpow2.f32 %v1926_v52  ;;  %v1805_v28 = vsub.f32 %v4593_v13, %v1739_v55  ;;  %v1928_v61 = vmul.f32 1.442695, %v1804_v1 }
 0x35e   :  { %v4242_v24 = vpop.eup %3047  ;;  %3061 = vpow2.f32 %v1924_v8  ;;  %v1741_v54 = vpop.xlane.xlu0 %1740 }
 0x35f   :  { %v4244_v4 = vpop.eup %3049  ;;  %v1930_v5 = vmul.f32 1.442695, %v1805_v28  ;;  %v1806_v10 = vsub.f32 %v4594_v62, %v1741_v54  ;;  %2042 = vadd.xlane.f32.xlu1 %v4242_v24 }
 0x360   :  { %2040 = vadd.xlane.f32.xlu0 %v4244_v4  ;;  %v1743_v38 = vpop.xlane.xlu1 %1742 }
 0x361   :  { %3063 = vpow2.f32 %v1930_v5  ;;  %v1807_v52 = vsub.f32 %v4595_v33, %v1743_v38  ;;  %v1932_v55 = vmul.f32 1.442695, %v1806_v10 }
 0x362   :  { %v4250_v43 = vpop.eup %3051  ;;  %3065 = vpow2.f32 %v1928_v61 }
 0x363   :  { %v4252_v8 = vpop.eup %3053  ;;  %v1934_v1 = vmul.f32 1.442695, %v1807_v52  ;;  %2046 = vadd.xlane.f32.xlu1 %v4250_v43 }
 0x364   :  { %2044 = vadd.xlane.f32.xlu0 %v4252_v8 }
 0x365   :  { %3067 = vpow2.f32 %v1934_v1 }
 0x366   :  { %v4256_v62 = vpop.eup %3055  ;;  %3069 = vpow2.f32 %v1932_v55 }
 0x367   :  { %v4258_v13 = vpop.eup %3057  ;;  %2050 = vadd.xlane.f32.xlu1 %v4256_v62 }
 0x368   :  { %4596 = vst [vmem:[#allocation6_spill] sm:$0xff] %v4258_v13  ;;  %2048 = vadd.xlane.f32.xlu0 %v4258_v13 }
 0x36a   :  { %v4262_v28 = vpop.eup %3059 }
 0x36b   :  { %4597 = vst [vmem:[#allocation7_spill] sm:$0xff] %v4262_v28  ;;  %v4264_v61 = vpop.eup %3061  ;;  %2054 = vadd.xlane.f32.xlu1 %v4262_v28 }
 0x36c   :  { %4598 = vst [vmem:[#allocation8_spill] sm:$0xff] %v4264_v61  ;;  %2052 = vadd.xlane.f32.xlu0 %v4264_v61 }
 0x36e   :  { %v4268_v54 = vpop.eup %3063 }
 0x36f   :  { %4599 = vst [vmem:[#allocation9_spill] sm:$0xff] %v4268_v54  ;;  %v4270_v5 = vpop.eup %3065  ;;  %2058 = vadd.xlane.f32.xlu1 %v4268_v54 }
 0x370   :  { %4600 = vst [vmem:[#allocation10_spill] sm:$0xff] %v4270_v5  ;;  %2056 = vadd.xlane.f32.xlu0 %v4270_v5 }
 0x372   :  { %v4274_v10 = vpop.eup %3067 }
 0x373   :  { %v4276_v38 = vpop.eup %3069  ;;  %2062 = vadd.xlane.f32.xlu1 %v4274_v10 }
 0x374   :  { %4601 = vst [vmem:[#allocation11_spill] sm:$0xff] %v4276_v38  ;;  %2060 = vadd.xlane.f32.xlu0 %v4276_v38 }
 0x37c   :  { %v1939_v33 = vpop.xlane.xlu1 %1938 }
 0x37d   :  { %3071 = vrcp.f32 %v1939_v33 }
 0x380   :  { %v1943_v52 = vpop.xlane.xlu1 %1942 }
 0x381   :  { %3073 = vrcp.f32 %v1943_v52  ;;  %v1937_v55 = vpop.xlane.xlu0 %1936 }
 0x382   :  { %3075 = vrcp.f32 %v1937_v55 }
 0x385   :  { %v1941_v1 = vpop.xlane.xlu0 %1940 }
 0x386   :  { %3077 = vrcp.f32 %v1941_v1 }
 0x388   :  { %v1947_v61 = vpop.xlane.xlu1 %1946 }
 0x389   :  { %3079 = vrcp.f32 %v1947_v61  ;;  %v1945_v54 = vpop.xlane.xlu0 %1944 }
 0x38a   :  { %v3072_v5 = vpop.eup %3071  ;;  %3081 = vrcp.f32 %v1945_v54 }
 0x38b   :  { %v2067_v28 = vmul.f32 %v3072_v5, %v4032_v40 }
 0x38c   :  { %v1951_v13 = vpop.xlane.xlu1 %1950 }
 0x38d   :  { %2193 = vst [vmem:[%s4539_s3 + $0x8] sm:$0xff] %v2067_v28  ;;  %3083 = vrcp.f32 %v1951_v13  ;;  %v1949_v33 = vpop.xlane.xlu0 %1948 }
 0x38e   :  { %v3074_v38 = vpop.eup %3073  ;;  %3085 = vrcp.f32 %v1949_v33 }
 0x38f   :  { %v3076_v52 = vpop.eup %3075  ;;  %v2071_v55 = vmul.f32 %v3074_v38, %v4037_v26 }
 0x390   :  { %v2065_v1 = vmul.f32 %v3076_v52, %v4039_v2  ;;  %v1955_v61 = vpop.xlane.xlu1 %1954 }
 0x391   :  { %2195 = vst [vmem:[%s4539_s3 + $0x18] sm:$0xff] %v2071_v55  ;;  %3087 = vrcp.f32 %v1955_v61  ;;  %v1953_v40 = vpop.xlane.xlu0 %1952 }
 0x392   :  { %2192 = vst [vmem:[%s4539_s3] sm:$0xff] %v2065_v1  ;;  %3089 = vrcp.f32 %v1953_v40 }
 0x393   :  { %v3078_v13 = vpop.eup %3077 }
 0x394   :  { %v2069_v28 = vmul.f32 %v3078_v13, %v4045_v17  ;;  %v1959_v54 = vpop.xlane.xlu1 %1958 }
 0x395   :  { %3091 = vrcp.f32 %v1959_v54  ;;  %v1957_v26 = vpop.xlane.xlu0 %1956 }
 0x396   :  { %v3080_v5 = vpop.eup %3079  ;;  %2194 = vst [vmem:[%s4539_s3 + $0x10] sm:$0xff] %v2069_v28  ;;  %3093 = vrcp.f32 %v1957_v26 }
 0x397   :  { %v3082_v2 = vpop.eup %3081  ;;  %v2075_v38 = vmul.f32 %v3080_v5, %v4050_v47 }
 0x398   :  { %v2073_v33 = vmul.f32 %v3082_v2, %v4052_v9  ;;  %v1963_v52 = vpop.xlane.xlu1 %1962 }
 0x399   :  { %2197 = vst [vmem:[%s4539_s3 + $0x28] sm:$0xff] %v2075_v38  ;;  %3095 = vrcp.f32 %v1963_v52  ;;  %v1961_v17 = vpop.xlane.xlu0 %1960 }
 0x39a   :  { %v3084_v55 = vpop.eup %3083  ;;  %2196 = vst [vmem:[%s4539_s3 + $0x20] sm:$0xff] %v2073_v33  ;;  %3097 = vrcp.f32 %v1961_v17 }
 0x39b   :  { %v3086_v1 = vpop.eup %3085  ;;  %v2079_v61 = vmul.f32 %v3084_v55, %v4058_v60 }
 0x39c   :  { %v2077_v47 = vmul.f32 %v3086_v1, %v4060_v48  ;;  %v1967_v40 = vpop.xlane.xlu1 %1966 }
 0x39d   :  { %2199 = vst [vmem:[%s4539_s3 + $0x38] sm:$0xff] %v2079_v61  ;;  %3099 = vrcp.f32 %v1967_v40  ;;  %v1965_v9 = vpop.xlane.xlu0 %1964 }
 0x39e   :  { %v3088_v13 = vpop.eup %3087  ;;  %2198 = vst [vmem:[%s4539_s3 + $0x30] sm:$0xff] %v2077_v47  ;;  %3101 = vrcp.f32 %v1965_v9 }
 0x39f   :  { %v3090_v28 = vpop.eup %3089  ;;  %v2083_v54 = vmul.f32 %v3088_v13, %v4066_v51 }
 0x3a0   :  { %v2081_v60 = vmul.f32 %v3090_v28, %v4068_v53  ;;  %v1971_v26 = vpop.xlane.xlu1 %1970 }
 0x3a1   :  { %2201 = vst [vmem:[%s4539_s3 + $0x48] sm:$0xff] %v2083_v54  ;;  %3103 = vrcp.f32 %v1971_v26  ;;  %v1969_v48 = vpop.xlane.xlu0 %1968 }
 0x3a2   :  { %v3092_v5 = vpop.eup %3091  ;;  %2200 = vst [vmem:[%s4539_s3 + $0x40] sm:$0xff] %v2081_v60  ;;  %3105 = vrcp.f32 %v1969_v48 }
 0x3a3   :  { %v3094_v2 = vpop.eup %3093  ;;  %v2087_v38 = vmul.f32 %v3092_v5, %v4074_v35 }
 0x3a4   :  { %v2085_v51 = vmul.f32 %v3094_v2, %v4076_v7  ;;  %v1975_v33 = vpop.xlane.xlu1 %1974 }
 0x3a5   :  { %2203 = vst [vmem:[%s4539_s3 + $0x58] sm:$0xff] %v2087_v38  ;;  %3107 = vrcp.f32 %v1975_v33  ;;  %v1973_v53 = vpop.xlane.xlu0 %1972 }
 0x3a6   :  { %v3096_v52 = vpop.eup %3095  ;;  %2202 = vst [vmem:[%s4539_s3 + $0x50] sm:$0xff] %v2085_v51  ;;  %3109 = vrcp.f32 %v1973_v53 }
 0x3a7   :  { %v3098_v17 = vpop.eup %3097  ;;  %v2091_v55 = vmul.f32 %v3096_v52, %v4082_v12 }
 0x3a8   :  { %v2089_v35 = vmul.f32 %v3098_v17, %v4084_v58  ;;  %v1979_v1 = vpop.xlane.xlu1 %1978 }
 0x3a9   :  { %2205 = vst [vmem:[%s4539_s3 + $0x68] sm:$0xff] %v2091_v55  ;;  %3111 = vrcp.f32 %v1979_v1  ;;  %v1977_v7 = vpop.xlane.xlu0 %1976 }
 0x3aa   :  { %v3100_v61 = vpop.eup %3099  ;;  %2204 = vst [vmem:[%s4539_s3 + $0x60] sm:$0xff] %v2089_v35  ;;  %3113 = vrcp.f32 %v1977_v7 }
 0x3ab   :  { %v3102_v47 = vpop.eup %3101  ;;  %v2095_v40 = vmul.f32 %v3100_v61, %v4090_v16 }
 0x3ac   :  { %v2093_v12 = vmul.f32 %v3102_v47, %v4092_v44  ;;  %v1983_v9 = vpop.xlane.xlu1 %1982 }
 0x3ad   :  { %2207 = vst [vmem:[%s4539_s3 + $0x78] sm:$0xff] %v2095_v40  ;;  %3115 = vrcp.f32 %v1983_v9  ;;  %v1981_v58 = vpop.xlane.xlu0 %1980 }
 0x3ae   :  { %v3104_v13 = vpop.eup %3103  ;;  %2206 = vst [vmem:[%s4539_s3 + $0x70] sm:$0xff] %v2093_v12  ;;  %3117 = vrcp.f32 %v1981_v58 }
 0x3af   :  { %v3106_v28 = vpop.eup %3105  ;;  %v2099_v54 = vmul.f32 %v3104_v13, %v4098_v49 }
 0x3b0   :  { %v2097_v16 = vmul.f32 %v3106_v28, %v4100_v39  ;;  %v1987_v60 = vpop.xlane.xlu1 %1986 }
 0x3b1   :  { %2209 = vst [vmem:[%s4539_s3 + $0x88] sm:$0xff] %v2099_v54  ;;  %3119 = vrcp.f32 %v1987_v60  ;;  %v1985_v44 = vpop.xlane.xlu0 %1984 }
 0x3b2   :  { %v3108_v26 = vpop.eup %3107  ;;  %2208 = vst [vmem:[%s4539_s3 + $0x80] sm:$0xff] %v2097_v16  ;;  %3121 = vrcp.f32 %v1985_v44 }
 0x3b3   :  { %v3110_v48 = vpop.eup %3109  ;;  %v2103_v5 = vmul.f32 %v3108_v26, %v4106_v21 }
 0x3b4   :  { %v2101_v49 = vmul.f32 %v3110_v48, %v4108_v23  ;;  %v1991_v2 = vpop.xlane.xlu1 %1990 }
 0x3b5   :  { %2211 = vst [vmem:[%s4539_s3 + $0x98] sm:$0xff] %v2103_v5  ;;  %3123 = vrcp.f32 %v1991_v2  ;;  %v1989_v39 = vpop.xlane.xlu0 %1988 }
 0x3b6   :  { %v3112_v38 = vpop.eup %3111  ;;  %2210 = vst [vmem:[%s4539_s3 + $0x90] sm:$0xff] %v2101_v49  ;;  %3125 = vrcp.f32 %v1989_v39 }
 0x3b7   :  { %v3114_v51 = vpop.eup %3113  ;;  %v2107_v33 = vmul.f32 %v3112_v38, %v4114_v63 }
 0x3b8   :  { %v2105_v21 = vmul.f32 %v3114_v51, %v4116_v0  ;;  %v1995_v53 = vpop.xlane.xlu1 %1994 }
 0x3b9   :  { %2213 = vst [vmem:[%s4539_s3 + $0xa8] sm:$0xff] %v2107_v33  ;;  %3127 = vrcp.f32 %v1995_v53  ;;  %v1993_v23 = vpop.xlane.xlu0 %1992 }
 0x3ba   :  { %v3116_v52 = vpop.eup %3115  ;;  %2212 = vst [vmem:[%s4539_s3 + $0xa0] sm:$0xff] %v2105_v21  ;;  %3129 = vrcp.f32 %v1993_v23 }
 0x3bb   :  { %v3118_v17 = vpop.eup %3117  ;;  %v2111_v55 = vmul.f32 %v3116_v52, %v4122_v31 }
 0x3bc   :  { %v2109_v63 = vmul.f32 %v3118_v17, %v4124_v56  ;;  %v1999_v35 = vpop.xlane.xlu1 %1998 }
 0x3bd   :  { %2215 = vst [vmem:[%s4539_s3 + $0xb8] sm:$0xff] %v2111_v55  ;;  %3131 = vrcp.f32 %v1999_v35  ;;  %v1997_v0 = vpop.xlane.xlu0 %1996 }
 0x3be   :  { %v3120_v1 = vpop.eup %3119  ;;  %2214 = vst [vmem:[%s4539_s3 + $0xb0] sm:$0xff] %v2109_v63  ;;  %3133 = vrcp.f32 %v1997_v0 }
 0x3bf   :  { %v3122_v7 = vpop.eup %3121  ;;  %v2115_v61 = vmul.f32 %v3120_v1, %v4130_v3 }
 0x3c0   :  { %v2113_v31 = vmul.f32 %v3122_v7, %v4132_v30  ;;  %v2003_v47 = vpop.xlane.xlu1 %2002 }
 0x3c1   :  { %2217 = vst [vmem:[%s4539_s3 + $0xc8] sm:$0xff] %v2115_v61  ;;  %3135 = vrcp.f32 %v2003_v47  ;;  %v2001_v56 = vpop.xlane.xlu0 %2000 }
 0x3c2   :  { %v3124_v40 = vpop.eup %3123  ;;  %2216 = vst [vmem:[%s4539_s3 + $0xc0] sm:$0xff] %v2113_v31  ;;  %3137 = vrcp.f32 %v2001_v56 }
 0x3c3   :  { %v3126_v12 = vpop.eup %3125  ;;  %v2119_v9 = vmul.f32 %v3124_v40, %v4138_v11 }
 0x3c4   :  { %v2117_v3 = vmul.f32 %v3126_v12, %v4140_v14  ;;  %v2007_v58 = vpop.xlane.xlu1 %2006 }
 0x3c5   :  { %2219 = vst [vmem:[%s4539_s3 + $0xd8] sm:$0xff] %v2119_v9  ;;  %3139 = vrcp.f32 %v2007_v58  ;;  %v2005_v30 = vpop.xlane.xlu0 %2004 }
 0x3c6   :  { %v3128_v13 = vpop.eup %3127  ;;  %2218 = vst [vmem:[%s4539_s3 + $0xd0] sm:$0xff] %v2117_v3  ;;  %3141 = vrcp.f32 %v2005_v30 }
 0x3c7   :  { %v3130_v28 = vpop.eup %3129  ;;  %v2123_v54 = vmul.f32 %v3128_v13, %v4146_v15 }
 0x3c8   :  { %v2121_v11 = vmul.f32 %v3130_v28, %v4148_v18  ;;  %v2011_v16 = vpop.xlane.xlu1 %2010 }
 0x3c9   :  { %2221 = vst [vmem:[%s4539_s3 + $0xe8] sm:$0xff] %v2123_v54  ;;  %3143 = vrcp.f32 %v2011_v16  ;;  %v2009_v14 = vpop.xlane.xlu0 %2008 }
 0x3ca   :  { %v3132_v60 = vpop.eup %3131  ;;  %2220 = vst [vmem:[%s4539_s3 + $0xe0] sm:$0xff] %v2121_v11  ;;  %3145 = vrcp.f32 %v2009_v14  ;;  %v4602_v11 = vld [vmem:[#allocation2_spill] sm:$0xff] }
 0x3cb   :  { %v3134_v44 = vpop.eup %3133  ;;  %v2127_v26 = vmul.f32 %v3132_v60, %v4154_v19 }
 0x3cc   :  { %v2125_v15 = vmul.f32 %v3134_v44, %v4156_v22  ;;  %v2015_v48 = vpop.xlane.xlu1 %2014  ;;  %v4603_v44 = vld [vmem:[#allocation3_spill] sm:$0xff] }
 0x3cd   :  { %2223 = vst [vmem:[%s4539_s3 + $0xf8] sm:$0xff] %v2127_v26  ;;  %3147 = vrcp.f32 %v2015_v48  ;;  %v2013_v18 = vpop.xlane.xlu0 %2012 }
 0x3ce   :  { %v3136_v5 = vpop.eup %3135  ;;  %2222 = vst [vmem:[%s4539_s3 + $0xf0] sm:$0xff] %v2125_v15  ;;  %3149 = vrcp.f32 %v2013_v18  ;;  %v4604_v15 = vld [vmem:[#allocation4_spill] sm:$0xff] }
 0x3cf   :  { %v3138_v49 = vpop.eup %3137  ;;  %v2131_v2 = vmul.f32 %v3136_v5, %v4162_v25 }
 0x3d0   :  { %v2129_v19 = vmul.f32 %v3138_v49, %v4164_v27  ;;  %v2019_v39 = vpop.xlane.xlu1 %2018 }
 0x3d1   :  { %2225 = vst [vmem:[%s4539_s3 + $0x108] sm:$0xff] %v2131_v2  ;;  %3151 = vrcp.f32 %v2019_v39  ;;  %v2017_v22 = vpop.xlane.xlu0 %2016 }
 0x3d2   :  { %v3140_v38 = vpop.eup %3139  ;;  %2224 = vst [vmem:[%s4539_s3 + $0x100] sm:$0xff] %v2129_v19  ;;  %3153 = vrcp.f32 %v2017_v22  ;;  %v4605_v19 = vld [vmem:[#allocation5_spill] sm:$0xff] }
 0x3d3   :  { %v3142_v51 = vpop.eup %3141  ;;  %v2135_v33 = vmul.f32 %v3140_v38, %v4170_v29 }
 0x3d4   :  { %v2133_v25 = vmul.f32 %v3142_v51, %v4172_v32  ;;  %v2023_v21 = vpop.xlane.xlu1 %2022 }
 0x3d5   :  { %2227 = vst [vmem:[%s4539_s3 + $0x118] sm:$0xff] %v2135_v33  ;;  %3155 = vrcp.f32 %v2023_v21  ;;  %v2021_v27 = vpop.xlane.xlu0 %2020 }
 0x3d6   :  { %v3144_v53 = vpop.eup %3143  ;;  %2226 = vst [vmem:[%s4539_s3 + $0x110] sm:$0xff] %v2133_v25  ;;  %3157 = vrcp.f32 %v2021_v27 }
 0x3d7   :  { %v3146_v23 = vpop.eup %3145  ;;  %v2139_v52 = vmul.f32 %v3144_v53, %v4178_v34 }
 0x3d8   :  { %v2137_v29 = vmul.f32 %v3146_v23, %v4180_v36  ;;  %v2027_v17 = vpop.xlane.xlu1 %2026 }
 0x3d9   :  { %2229 = vst [vmem:[%s4539_s3 + $0x128] sm:$0xff] %v2139_v52  ;;  %3159 = vrcp.f32 %v2027_v17  ;;  %v2025_v32 = vpop.xlane.xlu0 %2024 }
 0x3da   :  { %v3148_v55 = vpop.eup %3147  ;;  %2228 = vst [vmem:[%s4539_s3 + $0x120] sm:$0xff] %v2137_v29  ;;  %3161 = vrcp.f32 %v2025_v32 }
 0x3db   :  { %v3150_v63 = vpop.eup %3149  ;;  %v2143_v35 = vmul.f32 %v3148_v55, %v4186_v42 }
 0x3dc   :  { %v2141_v34 = vmul.f32 %v3150_v63, %v4188_v41  ;;  %v2031_v0 = vpop.xlane.xlu1 %2030  ;;  %v4606_v63 = vld [vmem:[#allocation6_spill] sm:$0xff] }
 0x3dd   :  { %2231 = vst [vmem:[%s4539_s3 + $0x138] sm:$0xff] %v2143_v35  ;;  %3163 = vrcp.f32 %v2031_v0  ;;  %v2029_v36 = vpop.xlane.xlu0 %2028 }
 0x3de   :  { %v3152_v1 = vpop.eup %3151  ;;  %2230 = vst [vmem:[%s4539_s3 + $0x130] sm:$0xff] %v2141_v34  ;;  %3165 = vrcp.f32 %v2029_v36  ;;  %v4607_v34 = vld [vmem:[#allocation7_spill] sm:$0xff]  ;;  %v4608_v36 = vld [vmem:[#allocation8_spill] sm:$0xff] }
 0x3df   :  { %v3154_v7 = vpop.eup %3153  ;;  %v2147_v61 = vmul.f32 %v3152_v1, %v4194_v37 }
 0x3e0   :  { %v2145_v42 = vmul.f32 %v3154_v7, %v4196_v45  ;;  %v2035_v31 = vpop.xlane.xlu1 %2034 }
 0x3e1   :  { %2233 = vst [vmem:[%s4539_s3 + $0x148] sm:$0xff] %v2147_v61  ;;  %3167 = vrcp.f32 %v2035_v31  ;;  %v2033_v41 = vpop.xlane.xlu0 %2032  ;;  %v4609_v61 = vld [vmem:[#allocation9_spill] sm:$0xff]  ;;  %v4610_v31 = vld [vmem:[#allocation10_spill] sm:$0xff] }
 0x3e2   :  { %v3156_v47 = vpop.eup %3155  ;;  %2232 = vst [vmem:[%s4539_s3 + $0x140] sm:$0xff] %v2145_v42  ;;  %3169 = vrcp.f32 %v2033_v41 }
 0x3e3   :  { %v3158_v56 = vpop.eup %3157  ;;  %v2151_v40 = vmul.f32 %v3156_v47, %v4202_v50 }
 0x3e4   :  { %v2149_v37 = vmul.f32 %v3158_v56, %v4204_v6  ;;  %v2039_v12 = vpop.xlane.xlu1 %2038 }
 0x3e5   :  { %2235 = vst [vmem:[%s4539_s3 + $0x158] sm:$0xff] %v2151_v40  ;;  %3171 = vrcp.f32 %v2039_v12  ;;  %v2037_v45 = vpop.xlane.xlu0 %2036 }
 0x3e6   :  { %v3160_v9 = vpop.eup %3159  ;;  %2234 = vst [vmem:[%s4539_s3 + $0x150] sm:$0xff] %v2149_v37  ;;  %3173 = vrcp.f32 %v2037_v45  ;;  %v4611_v37 = vld [vmem:[#allocation11_spill] sm:$0xff] }
 0x3e7   :  { %v3162_v3 = vpop.eup %3161  ;;  %v2155_v58 = vmul.f32 %v3160_v9, %v4210_v20 }
 0x3e8   :  { %v2153_v50 = vmul.f32 %v3162_v3, %v4212_v59  ;;  %v2043_v30 = vpop.xlane.xlu1 %2042 }
 0x3e9   :  { %2237 = vst [vmem:[%s4539_s3 + $0x168] sm:$0xff] %v2155_v58  ;;  %3175 = vrcp.f32 %v2043_v30  ;;  %v2041_v6 = vpop.xlane.xlu0 %2040 }
 0x3ea   :  { %v3164_v13 = vpop.eup %3163  ;;  %2236 = vst [vmem:[%s4539_s3 + $0x160] sm:$0xff] %v2153_v50  ;;  %3177 = vrcp.f32 %v2041_v6 }
 0x3eb   :  { %v3166_v28 = vpop.eup %3165  ;;  %v2159_v54 = vmul.f32 %v3164_v13, %v4218_v46 }
 0x3ec   :  { %v2157_v20 = vmul.f32 %v3166_v28, %v4602_v11  ;;  %v2047_v16 = vpop.xlane.xlu1 %2046 }
 0x3ed   :  { %2239 = vst [vmem:[%s4539_s3 + $0x178] sm:$0xff] %v2159_v54  ;;  %3179 = vrcp.f32 %v2047_v16  ;;  %v2045_v59 = vpop.xlane.xlu0 %2044 }
 0x3ee   :  { %v3168_v14 = vpop.eup %3167  ;;  %2238 = vst [vmem:[%s4539_s3 + $0x170] sm:$0xff] %v2157_v20  ;;  %3181 = vrcp.f32 %v2045_v59 }
 0x3ef   :  { %v3170_v60 = vpop.eup %3169  ;;  %v2163_v26 = vmul.f32 %v3168_v14, %v4603_v44 }
 0x3f0   :  { %v2161_v46 = vmul.f32 %v3170_v60, %v4604_v15  ;;  %v2051_v48 = vpop.xlane.xlu1 %2050 }
 0x3f1   :  { %2241 = vst [vmem:[%s4539_s3 + $0x188] sm:$0xff] %v2163_v26  ;;  %3183 = vrcp.f32 %v2051_v48  ;;  %v2049_v18 = vpop.xlane.xlu0 %2048 }
 0x3f2   :  { %v3172_v5 = vpop.eup %3171  ;;  %2240 = vst [vmem:[%s4539_s3 + $0x180] sm:$0xff] %v2161_v46  ;;  %3185 = vrcp.f32 %v2049_v18 }
 0x3f3   :  { %v3174_v49 = vpop.eup %3173  ;;  %v2167_v2 = vmul.f32 %v3172_v5, %v4234_v57 }
 0x3f4   :  { %v2165_v39 = vmul.f32 %v3174_v49, %v4605_v19  ;;  %v2055_v22 = vpop.xlane.xlu1 %2054 }
 0x3f5   :  { %2243 = vst [vmem:[%s4539_s3 + $0x198] sm:$0xff] %v2167_v2  ;;  %3187 = vrcp.f32 %v2055_v22  ;;  %v2053_v38 = vpop.xlane.xlu0 %2052 }
 0x3f6   :  { %v3176_v51 = vpop.eup %3175  ;;  %2242 = vst [vmem:[%s4539_s3 + $0x190] sm:$0xff] %v2165_v39  ;;  %3189 = vrcp.f32 %v2053_v38 }
 0x3f7   :  { %v3178_v33 = vpop.eup %3177  ;;  %v2171_v25 = vmul.f32 %v3176_v51, %v4242_v24 }
 0x3f8   :  { %v2169_v57 = vmul.f32 %v3178_v33, %v4244_v4  ;;  %v2059_v21 = vpop.xlane.xlu1 %2058 }
 0x3f9   :  { %2245 = vst [vmem:[%s4539_s3 + $0x1a8] sm:$0xff] %v2171_v25  ;;  %3191 = vrcp.f32 %v2059_v21  ;;  %v2057_v27 = vpop.xlane.xlu0 %2056 }
 0x3fa   :  { %v3180_v53 = vpop.eup %3179  ;;  %2244 = vst [vmem:[%s4539_s3 + $0x1a0] sm:$0xff] %v2169_v57  ;;  %3193 = vrcp.f32 %v2057_v27 }
 0x3fb   :  { %v3182_v23 = vpop.eup %3181  ;;  %v2175_v52 = vmul.f32 %v3180_v53, %v4250_v43 }
 0x3fc   :  { %v2173_v24 = vmul.f32 %v3182_v23, %v4252_v8  ;;  %v2063_v29 = vpop.xlane.xlu1 %2062 }
 0x3fd   :  { %2247 = vst [vmem:[%s4539_s3 + $0x1b8] sm:$0xff] %v2175_v52  ;;  %3195 = vrcp.f32 %v2063_v29  ;;  %v2061_v4 = vpop.xlane.xlu0 %2060 }
 0x3fe   :  { %v3184_v17 = vpop.eup %3183  ;;  %2246 = vst [vmem:[%s4539_s3 + $0x1b0] sm:$0xff] %v2173_v24  ;;  %3197 = vrcp.f32 %v2061_v4 }
 0x3ff   :  { %v3186_v32 = vpop.eup %3185  ;;  %v2179_v55 = vmul.f32 %v3184_v17, %v4256_v62 }
 0x400   :  { %v2177_v43 = vmul.f32 %v3186_v32, %v4606_v63 }
 0x401   :  { %2249 = vst [vmem:[%s4539_s3 + $0x1c8] sm:$0xff] %v2179_v55 }
 0x402   :  { %v3188_v8 = vpop.eup %3187  ;;  %2248 = vst [vmem:[%s4539_s3 + $0x1c0] sm:$0xff] %v2177_v43 }
 0x403   :  { %v3190_v35 = vpop.eup %3189  ;;  %v2183_v0 = vmul.f32 %v3188_v8, %v4607_v34 }
 0x404   :  { %v2181_v1 = vmul.f32 %v3190_v35, %v4608_v36 }
 0x405   :  { %2251 = vst [vmem:[%s4539_s3 + $0x1d8] sm:$0xff] %v2183_v0 }
 0x406   :  { %v3192_v62 = vpop.eup %3191  ;;  %2250 = vst [vmem:[%s4539_s3 + $0x1d0] sm:$0xff] %v2181_v1 }
 0x407   :  { %v3194_v7 = vpop.eup %3193  ;;  %v2187_v42 = vmul.f32 %v3192_v62, %v4609_v61 }
 0x408   :  { %v2185_v41 = vmul.f32 %v3194_v7, %v4610_v31 }
 0x409   :  { %2253 = vst [vmem:[%s4539_s3 + $0x1e8] sm:$0xff] %v2187_v42 }
 0x40a   :  { %v3196_v47 = vpop.eup %3195  ;;  %2252 = vst [vmem:[%s4539_s3 + $0x1e0] sm:$0xff] %v2185_v41 }
 0x40b   :  { %v3198_v56 = vpop.eup %3197  ;;  %v2191_v40 = vmul.f32 %v3196_v47, %v4274_v10 }
 0x40c   :  { %v2189_v12 = vmul.f32 %v3198_v56, %v4611_v37 }
 0x40d   :  { %2255 = vst [vmem:[%s4539_s3 + $0x1f8] sm:$0xff] %v2191_v40 }
 0x40e   :  { %2254 = vst [vmem:[%s4539_s3 + $0x1f0] sm:$0xff] %v2189_v12 }

</bundles_post_ra>
